<compile_context>
chip_gen: v5e
topology: v5e:2x2
jax: 0.10.0
libtpu: 0.0.40
codegen_flags: <defaults>
</compile_context>

<pallas_src>
import functools

import jax
import jax.numpy as jnp
import numpy as np
from jax.experimental import pallas as pl
from jax.experimental.pallas import tpu as pltpu


# ----------------------------------------------------------------------------
# Host-side (numpy) bilinear align_corners=True operators
# ----------------------------------------------------------------------------
def _interp_matrix_np(out_size, in_size):
    """(out_size, in_size) bilinear align_corners=True interpolation matrix."""
    if out_size == 1:
        src = np.zeros((1,), np.float64)
    else:
        src = np.arange(out_size, dtype=np.float64) * (in_size - 1) / (out_size - 1)
    i0 = np.clip(np.floor(src).astype(np.int64), 0, in_size - 1)
    i1 = np.clip(i0 + 1, 0, in_size - 1)
    frac = src - i0
    m = np.zeros((out_size, in_size), np.float64)
    m[np.arange(out_size), i0] += 1.0 - frac
    m[np.arange(out_size), i1] += frac
    return m


def _resize_op_t(h_in, w_in, h_out, w_out):
    """Kronecker resize operator, transposed: (h_in*w_in, h_out*w_out)."""
    k = np.kron(_interp_matrix_np(h_out, h_in), _interp_matrix_np(w_out, w_in))
    return np.ascontiguousarray(k.T)


def _padded_resize_op(h_in, w_in, h_out, w_out):
    """Resize operator for a map padded by 1 on each side with a constant.

    Returns:
      k_int  : (h_out*w_out, h_in*w_in) interior part of kron(A, B)
      border : (h_out*w_out, 1)         weight mass hitting the constant border
    resize(padded)  (spatial-major) = k_int @ interior + border * border_value
    """
    a = _interp_matrix_np(h_out, h_in + 2)
    b = _interp_matrix_np(w_out, w_in + 2)
    k_int = np.kron(a[:, 1:-1], b[:, 1:-1])                 # (s_out, s_in)
    border = np.outer(a.sum(1), b.sum(1)).ravel() - k_int.sum(1)
    return np.ascontiguousarray(k_int), border.reshape(-1, 1)


# ----------------------------------------------------------------------------
# Fused SegHead kernel (one grid step == one batch element)
# ----------------------------------------------------------------------------
def _seg_head_kernel(x3_ref, x2_ref, x1_ref,
                     wrT_ref, br_ref,
                     k3_ref, bv3_ref, rb3_ref,
                     w1aT_ref, w1bT_ref, b1_ref,
                     k2_ref, bv2_ref, rb1_ref,
                     w2a_ref, w2b_ref, b2_ref,
                     kf_ref, o_ref):
    f32, bf16 = jnp.float32, jnp.bfloat16

    x3 = x3_ref[0]            # (S3, C3)  bf16, spatial-major
    x2 = x2_ref[0]            # (S2, C2)  bf16, spatial-major
    x1 = x1_ref[0]            # (C1, S1)  bf16, channels-first

    # --- reduce_conv (spatial-major): relu(x3 @ Wr^T + br) -> (S3, d), 128 lanes
    h3 = jnp.maximum(
        jnp.dot(x3, wrT_ref[...], preferred_element_type=f32) + br_ref[...], 0.0)

    # --- bilinear resize of the (implicitly) padded map; border == relu(br)
    r3 = (jnp.dot(k3_ref[...], h3.astype(bf16), preferred_element_type=f32)
          + bv3_ref[...] * rb3_ref[...])                    # (S2, d)

    # --- up_conv1 on concat([x2, r3]) via split weights, then relu -> (S2, d)
    h2 = jnp.maximum(
        jnp.dot(x2, w1aT_ref[...], preferred_element_type=f32)
        + jnp.dot(r3.astype(bf16), w1bT_ref[...], preferred_element_type=f32)
        + b1_ref[...], 0.0)

    # --- bilinear resize of the padded map; border == relu(b1) -> (S1, d)
    r2 = (jnp.dot(k2_ref[...], h2.astype(bf16), preferred_element_type=f32)
          + bv2_ref[...] * rb1_ref[...])

    # --- switch to channels-first once (tile-aligned (S1,d)->(d,S1) transpose)
    r2_cf = r2.T.astype(bf16)                               # (d, S1)

    # --- up_conv2 classifier (rows padded to ncp sublanes, no relu/pad)
    cls = (jnp.dot(w2a_ref[...], x1, preferred_element_type=f32)
           + jnp.dot(w2b_ref[...], r2_cf, preferred_element_type=f32)
           + b2_ref[...])                                   # (ncp, S1)

    # --- final bilinear resize -> (ncp, Sf); full sublane/lane-dense store
    o_ref[0] = jnp.dot(cls.astype(bf16), kf_ref[...],
                       preferred_element_type=f32).astype(o_ref.dtype)


def _const_spec(shape):
    """BlockSpec for a grid-invariant operand; single-buffered when supported."""
    idx = lambda n: (0,) * len(shape)
    try:
        return pl.BlockSpec(shape, idx, pipeline_mode=pl.Buffered(1))
    except Exception:   # pipeline_mode / Buffered unavailable in this jax build
        return pl.BlockSpec(shape, idx)


@functools.partial(jax.jit, static_argnames=("out_h", "out_w", "out_dtype"))
def seg_head_forward(params, x1, x2, x3, *, out_h, out_w, out_dtype=jnp.float32):
    N, C3, H3, W3 = x3.shape
    _, C2, H2, W2 = x2.shape
    _, C1, H1, W1 = x1.shape
    d = params["reduce_w"].shape[0]
    ncls = params["up2_w"].shape[0]
    ncp = max(8, -(-ncls // 8) * 8)          # classifier rows padded to sublanes

    S3, S2, S1, Sf = H3 * W3, H2 * W2, H1 * W1, out_h * out_w

    # Resize operators (host-side numpy, static shapes).
    k3, bv3 = _padded_resize_op(H3, W3, H2, W2)      # (S2, S3), (S2, 1)
    k2, bv2 = _padded_resize_op(H2, W2, H1, W1)      # (S1, S2), (S1, 1)
    kft = _resize_op_t(H1, W1, out_h, out_w)         # (S1, Sf)

    bf, f32 = jnp.bfloat16, jnp.float32

    # Split the up-conv weights at the concat boundary (fuses the concats away)
    # and pad the classifier to `ncp` rows.
    w1a = params["up1_w"][:, :C2]
    w1b = params["up1_w"][:, C2:]
    w2a = jnp.zeros((ncp, C1), f32).at[:ncls].set(params["up2_w"][:, :C1])
    w2b = jnp.zeros((ncp, d), f32).at[:ncls].set(params["up2_w"][:, C1:])
    b2c = jnp.zeros((ncp, 1), f32).at[:ncls, 0].set(params["up2_b"])

    br_row = params["reduce_b"].reshape(1, d).astype(f32)
    b1_row = params["up1_b"].reshape(1, d).astype(f32)

    args = (
        # per-image activations, bf16 (halved HBM->VMEM DMA per grid step)
        jnp.transpose(x3, (0, 2, 3, 1)).reshape(N, S3, C3).astype(bf),
        jnp.transpose(x2, (0, 2, 3, 1)).reshape(N, S2, C2).astype(bf),
        x1.reshape(N, C1, S1).astype(bf),
        # grid-invariant operands (single-buffered)
        params["reduce_w"].T.astype(bf), br_row,
        jnp.asarray(k3, bf), jnp.asarray(bv3, f32), jnp.maximum(br_row, 0.0),
        w1a.T.astype(bf), w1b.T.astype(bf), b1_row,
        jnp.asarray(k2, bf), jnp.asarray(bv2, f32), jnp.maximum(b1_row, 0.0),
        w2a.astype(bf), w2b.astype(bf), b2c,
        jnp.asarray(kft, bf),
    )

    act_specs = [
        pl.BlockSpec((1, S3, C3), lambda n: (n, 0, 0)),
        pl.BlockSpec((1, S2, C2), lambda n: (n, 0, 0)),
        pl.BlockSpec((1, C1, S1), lambda n: (n, 0, 0)),
    ]
    const_specs = [_const_spec(a.shape) for a in args[3:]]

    # Explicit VMEM budget (v7x has only 64 MiB physical / 32 MiB scoped default).
    def nbytes(a):
        return int(np.prod(a.shape)) * jnp.dtype(a.dtype).itemsize
    act_bytes = sum(nbytes(a) // N for a in args[:3])
    const_bytes = sum(nbytes(a) for a in args[3:])
    out_block_bytes = ncp * Sf * jnp.dtype(out_dtype).itemsize
    vmem_limit = int(min(64 << 20,
                         max(16 << 20,
                             2 * (act_bytes + out_block_bytes) + const_bytes
                             + (4 << 20))))

    macs = (S3 * C3 * d + S2 * S3 * d + S2 * C2 * d + S2 * d * d + S1 * S2 * d
            + ncp * C1 * S1 + ncp * d * S1 + ncp * S1 * Sf)
    cost = pl.CostEstimate(
        flops=2 * macs * N,
        transcendentals=0,
        bytes_accessed=N * (act_bytes + out_block_bytes) + const_bytes,
    )

    out = pl.pallas_call(
        _seg_head_kernel,
        out_shape=jax.ShapeDtypeStruct((N, ncp, Sf), out_dtype),
        grid_spec=pltpu.PrefetchScalarGridSpec(
            num_scalar_prefetch=0,
            grid=(N,),                      # batch axis; parallel -> 2 TCs on v7x
            in_specs=act_specs + const_specs,
            out_specs=pl.BlockSpec((1, ncp, Sf), lambda n: (n, 0, 0)),
        ),
        compiler_params=pltpu.CompilerParams(
            dimension_semantics=("parallel",),
            vmem_limit_bytes=vmem_limit),
        cost_estimate=cost,
    )(*args)

    # Padded class rows sliced off here (free in XLA); the kernel always stores
    # the full unmasked 8-sublane x Sf-lane tile.
    return out[:, :ncls].reshape(N, ncls, out_h, out_w)


# ----------------------------------------------------------------------------
# Pure-JAX reference (mirrors the PyTorch module semantics exactly)
# ----------------------------------------------------------------------------
def _ref_convrelu(x, w, b, *, pad, relu):
    if pad:
        x = jnp.pad(x, ((0, 0), (0, 0), (1, 1), (1, 1)))
    y = jnp.einsum("nchw,oc->nohw", x, w,
                   precision=jax.lax.Precision.HIGHEST) + b[None, :, None, None]
    if relu:
        y = jnp.maximum(y, 0.0)
    return y


def _ref_resize(x, oh, ow):
    A = jnp.asarray(_interp_matrix_np(oh, x.shape[2]), jnp.float32)
    B = jnp.asarray(_interp_matrix_np(ow, x.shape[3]), jnp.float32)
    return jnp.einsum("ih,nchw,jw->ncij", A, x, B,
                      precision=jax.lax.Precision.HIGHEST)


def ref_forward(params, x1, x2, x3, out_h, out_w):
    x3 = _ref_convrelu(x3, params["reduce_w"], params["reduce_b"],
                       pad=True, relu=True)
    x3 = _ref_resize(x3, x2.shape[2], x2.shape[3])
    x2 = jnp.concatenate([x2, x3], axis=1)
    x2 = _ref_convrelu(x2, params["up1_w"], params["up1_b"],
                       pad=True, relu=True)
    x2 = _ref_resize(x2, x1.shape[2], x1.shape[3])
    x1 = jnp.concatenate([x1, x2], axis=1)
    x1 = _ref_convrelu(x1, params["up2_w"], params["up2_b"],
                       pad=False, relu=False)
    return _ref_resize(x1, out_h, out_w)


# ----------------------------------------------------------------------------
# Deterministic parameter init (shapes follow SegHead.__init__)
# ----------------------------------------------------------------------------
def init_params(key, d_model=128, n_classes=2):
    def conv_init(k, cout, cin):
        k1, k2 = jax.random.split(k)
        bound = 1.0 / np.sqrt(cin)
        w = jax.random.uniform(k1, (cout, cin), jnp.float32, -bound, bound)
        b = jax.random.uniform(k2, (cout,), jnp.float32, -bound, bound)
        return w, b

    k = jax.random.split(key, 3)
    rw, rb = conv_init(k[0], d_model, 576)
    u1w, u1b = conv_init(k[1], d_model, 48 + d_model)
    u2w, u2b = conv_init(k[2], n_classes, 16 + d_model)
    return dict(reduce_w=rw, reduce_b=rb,
                up1_w=u1w, up1_b=u1b,
                up2_w=u2w, up2_b=u2b)


if __name__ == "__main__":
    key = jax.random.PRNGKey(0)
    kp, k1, k2, k3 = jax.random.split(key, 4)
    params = init_params(kp)

    N = 2
    x1 = jax.random.normal(k1, (N, 16, 16, 16), jnp.float32)   # fine stage
    x2 = jax.random.normal(k2, (N, 48, 8, 8), jnp.float32)     # mid stage
    x3 = jax.random.normal(k3, (N, 576, 4, 4), jnp.float32)    # coarse stage
    x_shape = (N, 3, 32, 32)                                   # target image shape

    out = seg_head_forward(params, x1, x2, x3,
                           out_h=x_shape[2], out_w=x_shape[3])
    out = jax.block_until_ready(out)

    o = np.asarray(out)
    ref = np.asarray(ref_forward(params, x1, x2, x3, x_shape[2], x_shape[3]))
    assert o.shape == (N, 2, 32, 32), o.shape
    assert np.all(np.isfinite(o))
    max_err = float(np.max(np.abs(o - ref)))
    # bf16 matmul operands (f32 accumulate) -> loosened tolerance vs f32 ref.
    assert np.allclose(o, ref, atol=5e-2, rtol=5e-2), max_err
    print("KERNEL_OK")
</pallas_src>

<mosaic_0001>
module attributes {stable_mosaic.version = 11 : i64} {
  func.func @_seg_head_kernel(%arg0: i32, %arg1: memref<1x16x576xbf16, #tpu.memory_space<vmem>>, %arg2: memref<1x64x48xbf16, #tpu.memory_space<vmem>>, %arg3: memref<1x16x256xbf16, #tpu.memory_space<vmem>>, %arg4: memref<576x128xbf16, #tpu.memory_space<vmem>>, %arg5: memref<1x128xf32, #tpu.memory_space<vmem>>, %arg6: memref<64x16xbf16, #tpu.memory_space<vmem>>, %arg7: memref<64x1xf32, #tpu.memory_space<vmem>>, %arg8: memref<1x128xf32, #tpu.memory_space<vmem>>, %arg9: memref<48x128xbf16, #tpu.memory_space<vmem>>, %arg10: memref<128x128xbf16, #tpu.memory_space<vmem>>, %arg11: memref<1x128xf32, #tpu.memory_space<vmem>>, %arg12: memref<256x64xbf16, #tpu.memory_space<vmem>>, %arg13: memref<256x1xf32, #tpu.memory_space<vmem>>, %arg14: memref<1x128xf32, #tpu.memory_space<vmem>>, %arg15: memref<8x16xbf16, #tpu.memory_space<vmem>>, %arg16: memref<8x128xbf16, #tpu.memory_space<vmem>>, %arg17: memref<8x1xf32, #tpu.memory_space<vmem>>, %arg18: memref<256x1024xbf16, #tpu.memory_space<vmem>>, %arg19: memref<1x8x1024xf32, #tpu.memory_space<vmem>>) attributes {dimension_semantics = [#tpu.dimension_semantics<parallel>], iteration_bounds = array<i64: 2>, scalar_prefetch = 0 : i64, scratch_operands = 0 : i64, tpu.core_type = #tpu.core_type<tc>, window_params = [{transform_indices = @transform_0, window_bounds = array<i64: 1, 16, 576>}, {transform_indices = @transform_1, window_bounds = array<i64: 1, 64, 48>}, {transform_indices = @transform_2, window_bounds = array<i64: 1, 16, 256>}, {pipeline_mode = #tpu.pipeline_mode<synchronous>, transform_indices = @transform_3, window_bounds = array<i64: 576, 128>}, {pipeline_mode = #tpu.pipeline_mode<synchronous>, transform_indices = @transform_4, window_bounds = array<i64: 1, 128>}, {pipeline_mode = #tpu.pipeline_mode<synchronous>, transform_indices = @transform_5, window_bounds = array<i64: 64, 16>}, {pipeline_mode = #tpu.pipeline_mode<synchronous>, transform_indices = @transform_6, window_bounds = array<i64: 64, 1>}, {pipeline_mode = #tpu.pipeline_mode<synchronous>, transform_indices = @transform_7, window_bounds = array<i64: 1, 128>}, {pipeline_mode = #tpu.pipeline_mode<synchronous>, transform_indices = @transform_8, window_bounds = array<i64: 48, 128>}, {pipeline_mode = #tpu.pipeline_mode<synchronous>, transform_indices = @transform_9, window_bounds = array<i64: 128, 128>}, {pipeline_mode = #tpu.pipeline_mode<synchronous>, transform_indices = @transform_10, window_bounds = array<i64: 1, 128>}, {pipeline_mode = #tpu.pipeline_mode<synchronous>, transform_indices = @transform_11, window_bounds = array<i64: 256, 64>}, {pipeline_mode = #tpu.pipeline_mode<synchronous>, transform_indices = @transform_12, window_bounds = array<i64: 256, 1>}, {pipeline_mode = #tpu.pipeline_mode<synchronous>, transform_indices = @transform_13, window_bounds = array<i64: 1, 128>}, {pipeline_mode = #tpu.pipeline_mode<synchronous>, transform_indices = @transform_14, window_bounds = array<i64: 8, 16>}, {pipeline_mode = #tpu.pipeline_mode<synchronous>, transform_indices = @transform_15, window_bounds = array<i64: 8, 128>}, {pipeline_mode = #tpu.pipeline_mode<synchronous>, transform_indices = @transform_16, window_bounds = array<i64: 8, 1>}, {pipeline_mode = #tpu.pipeline_mode<synchronous>, transform_indices = @transform_17, window_bounds = array<i64: 256, 1024>}, {transform_indices = @transform_18, window_bounds = array<i64: 1, 8, 1024>}]} {
    %c0 = arith.constant 0 : index
    %c0_0 = arith.constant 0 : index
    %c0_1 = arith.constant 0 : index
    %0 = vector.load %arg1[%c0, %c0_0, %c0_1] : memref<1x16x576xbf16, #tpu.memory_space<vmem>>, vector<1x16x576xbf16>
    %1 = vector.shape_cast %0 : vector<1x16x576xbf16> to vector<16x576xbf16>
    %c0_2 = arith.constant 0 : index
    %c0_3 = arith.constant 0 : index
    %c0_4 = arith.constant 0 : index
    %2 = vector.load %arg2[%c0_2, %c0_3, %c0_4] : memref<1x64x48xbf16, #tpu.memory_space<vmem>>, vector<1x64x48xbf16>
    %3 = vector.shape_cast %2 : vector<1x64x48xbf16> to vector<64x48xbf16>
    %c0_5 = arith.constant 0 : index
    %c0_6 = arith.constant 0 : index
    %c0_7 = arith.constant 0 : index
    %4 = vector.load %arg3[%c0_5, %c0_6, %c0_7] : memref<1x16x256xbf16, #tpu.memory_space<vmem>>, vector<1x16x256xbf16>
    %5 = vector.shape_cast %4 : vector<1x16x256xbf16> to vector<16x256xbf16>
    %c0_8 = arith.constant 0 : index
    %c0_9 = arith.constant 0 : index
    %6 = vector.load %arg4[%c0_8, %c0_9] : memref<576x128xbf16, #tpu.memory_space<vmem>>, vector<576x128xbf16>
    %cst = arith.constant dense<0.000000e+00> : vector<16x128xf32>
    %7 = tpu.matmul %1, %6, %cst {dimension_numbers = #tpu.dot_dimension_numbers<[1], [0], [0], [1], [0, 0, 1, 1], [], []>} : vector<16x576xbf16>, vector<576x128xbf16>, vector<16x128xf32> -> vector<16x128xf32>
    %c0_10 = arith.constant 0 : index
    %c0_11 = arith.constant 0 : index
    %8 = vector.load %arg5[%c0_10, %c0_11] : memref<1x128xf32, #tpu.memory_space<vmem>>, vector<1x128xf32>
    %9 = vector.broadcast %8 : vector<1x128xf32> to vector<16x128xf32>
    %10 = arith.addf %7, %9 : vector<16x128xf32>
    %cst_12 = arith.constant 0.000000e+00 : f32
    %11 = vector.broadcast %cst_12 : f32 to vector<16x128xf32>
    %12 = arith.maximumf %10, %11 : vector<16x128xf32>
    %c0_13 = arith.constant 0 : index
    %c0_14 = arith.constant 0 : index
    %13 = vector.load %arg6[%c0_13, %c0_14] : memref<64x16xbf16, #tpu.memory_space<vmem>>, vector<64x16xbf16>
    %14 = arith.truncf %12 : vector<16x128xf32> to vector<16x128xbf16>
    %cst_15 = arith.constant dense<0.000000e+00> : vector<64x128xf32>
    %15 = tpu.matmul %13, %14, %cst_15 {dimension_numbers = #tpu.dot_dimension_numbers<[1], [0], [0], [1], [0, 0, 1, 1], [], []>} : vector<64x16xbf16>, vector<16x128xbf16>, vector<64x128xf32> -> vector<64x128xf32>
    %c0_16 = arith.constant 0 : index
    %c0_17 = arith.constant 0 : index
    %16 = vector.load %arg7[%c0_16, %c0_17] : memref<64x1xf32, #tpu.memory_space<vmem>>, vector<64x1xf32>
    %c0_18 = arith.constant 0 : index
    %c0_19 = arith.constant 0 : index
    %17 = vector.load %arg8[%c0_18, %c0_19] : memref<1x128xf32, #tpu.memory_space<vmem>>, vector<1x128xf32>
    %18 = vector.broadcast %16 : vector<64x1xf32> to vector<64x128xf32>
    %19 = vector.broadcast %17 : vector<1x128xf32> to vector<64x128xf32>
    %20 = arith.mulf %18, %19 : vector<64x128xf32>
    %21 = arith.addf %15, %20 : vector<64x128xf32>
    %c0_20 = arith.constant 0 : index
    %c0_21 = arith.constant 0 : index
    %22 = vector.load %arg9[%c0_20, %c0_21] : memref<48x128xbf16, #tpu.memory_space<vmem>>, vector<48x128xbf16>
    %cst_22 = arith.constant dense<0.000000e+00> : vector<64x128xf32>
    %23 = tpu.matmul %3, %22, %cst_22 {dimension_numbers = #tpu.dot_dimension_numbers<[1], [0], [0], [1], [0, 0, 1, 1], [], []>} : vector<64x48xbf16>, vector<48x128xbf16>, vector<64x128xf32> -> vector<64x128xf32>
    %24 = arith.truncf %21 : vector<64x128xf32> to vector<64x128xbf16>
    %c0_23 = arith.constant 0 : index
    %c0_24 = arith.constant 0 : index
    %25 = vector.load %arg10[%c0_23, %c0_24] : memref<128x128xbf16, #tpu.memory_space<vmem>>, vector<128x128xbf16>
    %cst_25 = arith.constant dense<0.000000e+00> : vector<64x128xf32>
    %26 = tpu.matmul %24, %25, %cst_25 {dimension_numbers = #tpu.dot_dimension_numbers<[1], [0], [0], [1], [0, 0, 1, 1], [], []>} : vector<64x128xbf16>, vector<128x128xbf16>, vector<64x128xf32> -> vector<64x128xf32>
    %27 = arith.addf %23, %26 : vector<64x128xf32>
    %c0_26 = arith.constant 0 : index
    %c0_27 = arith.constant 0 : index
    %28 = vector.load %arg11[%c0_26, %c0_27] : memref<1x128xf32, #tpu.memory_space<vmem>>, vector<1x128xf32>
    %29 = vector.broadcast %28 : vector<1x128xf32> to vector<64x128xf32>
    %30 = arith.addf %27, %29 : vector<64x128xf32>
    %cst_28 = arith.constant 0.000000e+00 : f32
    %31 = vector.broadcast %cst_28 : f32 to vector<64x128xf32>
    %32 = arith.maximumf %30, %31 : vector<64x128xf32>
    %c0_29 = arith.constant 0 : index
    %c0_30 = arith.constant 0 : index
    %33 = vector.load %arg12[%c0_29, %c0_30] : memref<256x64xbf16, #tpu.memory_space<vmem>>, vector<256x64xbf16>
    %34 = arith.truncf %32 : vector<64x128xf32> to vector<64x128xbf16>
    %cst_31 = arith.constant dense<0.000000e+00> : vector<256x128xf32>
    %35 = tpu.matmul %33, %34, %cst_31 {dimension_numbers = #tpu.dot_dimension_numbers<[1], [0], [0], [1], [0, 0, 1, 1], [], []>} : vector<256x64xbf16>, vector<64x128xbf16>, vector<256x128xf32> -> vector<256x128xf32>
    %c0_32 = arith.constant 0 : index
    %c0_33 = arith.constant 0 : index
    %36 = vector.load %arg13[%c0_32, %c0_33] : memref<256x1xf32, #tpu.memory_space<vmem>>, vector<256x1xf32>
    %c0_34 = arith.constant 0 : index
    %c0_35 = arith.constant 0 : index
    %37 = vector.load %arg14[%c0_34, %c0_35] : memref<1x128xf32, #tpu.memory_space<vmem>>, vector<1x128xf32>
    %38 = vector.broadcast %36 : vector<256x1xf32> to vector<256x128xf32>
    %39 = vector.broadcast %37 : vector<1x128xf32> to vector<256x128xf32>
    %40 = arith.mulf %38, %39 : vector<256x128xf32>
    %41 = arith.addf %35, %40 : vector<256x128xf32>
    %42 = tpu.transpose %41, [1, 0] : vector<256x128xf32> -> vector<128x256xf32>
    %43 = arith.truncf %42 : vector<128x256xf32> to vector<128x256xbf16>
    %c0_36 = arith.constant 0 : index
    %c0_37 = arith.constant 0 : index
    %44 = vector.load %arg15[%c0_36, %c0_37] : memref<8x16xbf16, #tpu.memory_space<vmem>>, vector<8x16xbf16>
    %cst_38 = arith.constant dense<0.000000e+00> : vector<8x256xf32>
    %45 = tpu.matmul %44, %5, %cst_38 {dimension_numbers = #tpu.dot_dimension_numbers<[1], [0], [0], [1], [0, 0, 1, 1], [], []>} : vector<8x16xbf16>, vector<16x256xbf16>, vector<8x256xf32> -> vector<8x256xf32>
    %c0_39 = arith.constant 0 : index
    %c0_40 = arith.constant 0 : index
    %46 = vector.load %arg16[%c0_39, %c0_40] : memref<8x128xbf16, #tpu.memory_space<vmem>>, vector<8x128xbf16>
    %cst_41 = arith.constant dense<0.000000e+00> : vector<8x256xf32>
    %47 = tpu.matmul %46, %43, %cst_41 {dimension_numbers = #tpu.dot_dimension_numbers<[1], [0], [0], [1], [0, 0, 1, 1], [], []>} : vector<8x128xbf16>, vector<128x256xbf16>, vector<8x256xf32> -> vector<8x256xf32>
    %48 = arith.addf %45, %47 : vector<8x256xf32>
    %c0_42 = arith.constant 0 : index
    %c0_43 = arith.constant 0 : index
    %49 = vector.load %arg17[%c0_42, %c0_43] : memref<8x1xf32, #tpu.memory_space<vmem>>, vector<8x1xf32>
    %50 = vector.broadcast %49 : vector<8x1xf32> to vector<8x256xf32>
    %51 = arith.addf %48, %50 : vector<8x256xf32>
    %52 = arith.truncf %51 : vector<8x256xf32> to vector<8x256xbf16>
    %c0_44 = arith.constant 0 : index
    %c0_45 = arith.constant 0 : index
    %53 = vector.load %arg18[%c0_44, %c0_45] : memref<256x1024xbf16, #tpu.memory_space<vmem>>, vector<256x1024xbf16>
    %cst_46 = arith.constant dense<0.000000e+00> : vector<8x1024xf32>
    %54 = tpu.matmul %52, %53, %cst_46 {dimension_numbers = #tpu.dot_dimension_numbers<[1], [0], [0], [1], [0, 0, 1, 1], [], []>} : vector<8x256xbf16>, vector<256x1024xbf16>, vector<8x1024xf32> -> vector<8x1024xf32>
    %c0_47 = arith.constant 0 : index
    %c0_48 = arith.constant 0 : index
    %c0_49 = arith.constant 0 : index
    %55 = vector.load %arg19[%c0_47, %c0_48, %c0_49] : memref<1x8x1024xf32, #tpu.memory_space<vmem>>, vector<1x8x1024xf32>
    %56 = vector.shape_cast %55 : vector<1x8x1024xf32> to vector<8x1024xf32>
    %57 = vector.shape_cast %54 : vector<8x1024xf32> to vector<1x8x1024xf32>
    tpu.vector_store %arg19[%c0_47, %c0_48, %c0_49], %57 {strides = array<i32>} : memref<1x8x1024xf32, #tpu.memory_space<vmem>>, vector<1x8x1024xf32>,
    return
  }
  func.func @transform_0(%arg0: i32) -> (i32, i32, i32) {
    %c0_i32 = arith.constant 0 : i32
    %c0_i32_0 = arith.constant 0 : i32
    %c0_i32_1 = arith.constant 0 : i32
    return %arg0, %c0_i32, %c0_i32_0 : i32, i32, i32
  }
  func.func @transform_1(%arg0: i32) -> (i32, i32, i32) {
    %c0_i32 = arith.constant 0 : i32
    %c0_i32_0 = arith.constant 0 : i32
    %c0_i32_1 = arith.constant 0 : i32
    return %arg0, %c0_i32, %c0_i32_0 : i32, i32, i32
  }
  func.func @transform_2(%arg0: i32) -> (i32, i32, i32) {
    %c0_i32 = arith.constant 0 : i32
    %c0_i32_0 = arith.constant 0 : i32
    %c0_i32_1 = arith.constant 0 : i32
    return %arg0, %c0_i32, %c0_i32_0 : i32, i32, i32
  }
  func.func @transform_3(%arg0: i32) -> (i32, i32) {
    %c0_i32 = arith.constant 0 : i32
    %c0_i32_0 = arith.constant 0 : i32
    %c0_i32_1 = arith.constant 0 : i32
    return %c0_i32, %c0_i32_0 : i32, i32
  }
  func.func @transform_4(%arg0: i32) -> (i32, i32) {
    %c0_i32 = arith.constant 0 : i32
    %c0_i32_0 = arith.constant 0 : i32
    %c0_i32_1 = arith.constant 0 : i32
    return %c0_i32, %c0_i32_0 : i32, i32
  }
  func.func @transform_5(%arg0: i32) -> (i32, i32) {
    %c0_i32 = arith.constant 0 : i32
    %c0_i32_0 = arith.constant 0 : i32
    %c0_i32_1 = arith.constant 0 : i32
    return %c0_i32, %c0_i32_0 : i32, i32
  }
  func.func @transform_6(%arg0: i32) -> (i32, i32) {
    %c0_i32 = arith.constant 0 : i32
    %c0_i32_0 = arith.constant 0 : i32
    %c0_i32_1 = arith.constant 0 : i32
    return %c0_i32, %c0_i32_0 : i32, i32
  }
  func.func @transform_7(%arg0: i32) -> (i32, i32) {
    %c0_i32 = arith.constant 0 : i32
    %c0_i32_0 = arith.constant 0 : i32
    %c0_i32_1 = arith.constant 0 : i32
    return %c0_i32, %c0_i32_0 : i32, i32
  }
  func.func @transform_8(%arg0: i32) -> (i32, i32) {
    %c0_i32 = arith.constant 0 : i32
    %c0_i32_0 = arith.constant 0 : i32
    %c0_i32_1 = arith.constant 0 : i32
    return %c0_i32, %c0_i32_0 : i32, i32
  }
  func.func @transform_9(%arg0: i32) -> (i32, i32) {
    %c0_i32 = arith.constant 0 : i32
    %c0_i32_0 = arith.constant 0 : i32
    %c0_i32_1 = arith.constant 0 : i32
    return %c0_i32, %c0_i32_0 : i32, i32
  }
  func.func @transform_10(%arg0: i32) -> (i32, i32) {
    %c0_i32 = arith.constant 0 : i32
    %c0_i32_0 = arith.constant 0 : i32
    %c0_i32_1 = arith.constant 0 : i32
    return %c0_i32, %c0_i32_0 : i32, i32
  }
  func.func @transform_11(%arg0: i32) -> (i32, i32) {
    %c0_i32 = arith.constant 0 : i32
    %c0_i32_0 = arith.constant 0 : i32
    %c0_i32_1 = arith.constant 0 : i32
    return %c0_i32, %c0_i32_0 : i32, i32
  }
  func.func @transform_12(%arg0: i32) -> (i32, i32) {
    %c0_i32 = arith.constant 0 : i32
    %c0_i32_0 = arith.constant 0 : i32
    %c0_i32_1 = arith.constant 0 : i32
    return %c0_i32, %c0_i32_0 : i32, i32
  }
  func.func @transform_13(%arg0: i32) -> (i32, i32) {
    %c0_i32 = arith.constant 0 : i32
    %c0_i32_0 = arith.constant 0 : i32
    %c0_i32_1 = arith.constant 0 : i32
    return %c0_i32, %c0_i32_0 : i32, i32
  }
  func.func @transform_14(%arg0: i32) -> (i32, i32) {
    %c0_i32 = arith.constant 0 : i32
    %c0_i32_0 = arith.constant 0 : i32
    %c0_i32_1 = arith.constant 0 : i32
    return %c0_i32, %c0_i32_0 : i32, i32
  }
  func.func @transform_15(%arg0: i32) -> (i32, i32) {
    %c0_i32 = arith.constant 0 : i32
    %c0_i32_0 = arith.constant 0 : i32
    %c0_i32_1 = arith.constant 0 : i32
    return %c0_i32, %c0_i32_0 : i32, i32
  }
  func.func @transform_16(%arg0: i32) -> (i32, i32) {
    %c0_i32 = arith.constant 0 : i32
    %c0_i32_0 = arith.constant 0 : i32
    %c0_i32_1 = arith.constant 0 : i32
    return %c0_i32, %c0_i32_0 : i32, i32
  }
  func.func @transform_17(%arg0: i32) -> (i32, i32) {
    %c0_i32 = arith.constant 0 : i32
    %c0_i32_0 = arith.constant 0 : i32
    %c0_i32_1 = arith.constant 0 : i32
    return %c0_i32, %c0_i32_0 : i32, i32
  }
  func.func @transform_18(%arg0: i32) -> (i32, i32, i32) {
    %c0_i32 = arith.constant 0 : i32
    %c0_i32_0 = arith.constant 0 : i32
    %c0_i32_1 = arith.constant 0 : i32
    return %arg0, %c0_i32, %c0_i32_0 : i32, i32, i32
  }
}

</mosaic_0001>

<bundles_post_ra>
// kernel: seg_head_forward.1
= control target key start
LH: loop header
LB: loop body
LE: loop exit
PB: predicated region body
PF: predicated region fallthrough
CT: control target
= control target key end

     0   :  { %s4368_s27 = smov 0   ;;  %s5708_s0 = inlined_call_operand.vmem [shape: bf16[2,16,576], index: 0, kind: input, shape index: {}]   ;;  %s5709_s1 = inlined_call_operand.vmem [shape: bf16[2,64,48], index: 1, kind: input, shape index: {}]   ;;  %s5710_s2 = inlined_call_operand.vmem [shape: bf16[2,16,256], index: 2, kind: input, shape index: {}]   ;;  %s5711_s3 = inlined_call_operand.vmem [shape: bf16[576,128], index: 3, kind: input, shape index: {}]   ;;  %s5712_s4 = inlined_call_operand.vmem [shape: f32[1,128], index: 4, kind: input, shape index: {}]   ;;  %s5713_s5 = inlined_call_operand.vmem [shape: bf16[64,16], index: 5, kind: input, shape index: {}]   ;;  %s5714_s6 = inlined_call_operand.vmem [shape: f32[64,1], index: 6, kind: input, shape index: {}]   ;;  %s5715_s7 = inlined_call_operand.vmem [shape: f32[1,128], index: 7, kind: input, shape index: {}]   ;;  %s5716_s8 = inlined_call_operand.vmem [shape: bf16[48,128], index: 8, kind: input, shape index: {}]   ;;  %s5717_s9 = inlined_call_operand.vmem [shape: bf16[128,128], index: 9, kind: input, shape index: {}]   ;;  %s5718_s10 = inlined_call_operand.vmem [shape: f32[1,128], index: 10, kind: input, shape index: {}]   ;;  %s5719_s11 = inlined_call_operand.vmem [shape: bf16[256,64], index: 11, kind: input, shape index: {}]   ;;  %s5720_s12 = inlined_call_operand.vmem [shape: f32[256,1], index: 12, kind: input, shape index: {}]   ;;  %s5721_s13 = inlined_call_operand.vmem [shape: f32[1,128], index: 13, kind: input, shape index: {}]   ;;  %s5722_s14 = inlined_call_operand.vmem [shape: bf16[8,16], index: 14, kind: input, shape index: {}]   ;;  %s5723_s15 = inlined_call_operand.vmem [shape: bf16[8,128], index: 15, kind: input, shape index: {}]   ;;  %s5724_s16 = inlined_call_operand.vmem [shape: f32[8,1], index: 16, kind: input, shape index: {}]   ;;  %s5725_s17 = inlined_call_operand.vmem [shape: bf16[256,1024], index: 17, kind: input, shape index: {}]   ;;  %s5726_s18 = inlined_call_operand.vmem [shape: f32[2,8,1024], index: 18, kind: output, shape index: {}]  }
   0x1   :  { %5727 = sst [smem:[#allocation2_spill]] %s5708_s0 }
   0x2   :  { %5728 = sst [smem:[#allocation3_spill]] %s5709_s1 }
   0x3   :  { %5729 = sst [smem:[#allocation4_spill]] %s5710_s2 }
   0x4 LB: > { %s3061_s28 = sadd.s32 4294967295, %s4270_s27   ;;  %p3065_p0 = scmp.ge.s32.totalorder %s4270_s27, 1  ;;  %s4270_s27 = sphi %s4368_s27, %s28_s27  }
   0x5   : > { %p532_p1 = scmp.lt.s32.totalorder %s4270_s27, 3 }
   0x7   : > { %p533_p2 = pnand %p3065_p0, %p532_p1 }
   0x8   : > { %p596_p3 = scmp.lt.s32.totalorder (!%p533_p2), %s3061_s28, 1  ;;  %s5730_s1 = sld [smem:[#allocation2_spill]] (!%p533_p2) }
   0x9   : > { %536 = sbr.rel (%p533_p2) target bundleno = 1548 (0x60c), region = 92  ;;  %s5731_s2 = sld [smem:[#allocation3_spill]] (!%p533_p2) }
   0xa   : > { %s5732_s22 = sld [smem:[#allocation4_spill]] (!%p533_p2) }
   0xe   : > { %v3947_v0 = vld [vmem:[%s5711_s3 + $0x38] sm:$0xff]  ;;  %v3946_v4 = vld [vmem:[%s5711_s3 + $0x30] sm:$0xff]  ;;  %v3945_v8 = vld [vmem:[%s5711_s3 + $0x28] sm:$0xff]  ;;  %s5734_s28 = smov (!%p596_p3, %s3061_s28), 1  ;;  %v4272_v26 = vmov 0   ;;  %vm950_vm0 = vcmask 523264  }
   0xf   : > { %v3963_v1 = vld [vmem:[%s5711_s3 + $0xb8] sm:$0xff]  ;;  %954 = vmatpush.bf16.msra.mxu0 %v3947_v0  ;;  %v3962_v5 = vld [vmem:[%s5711_s3 + $0xb0] sm:$0xff]  ;;  %v3961_v9 = vld [vmem:[%s5711_s3 + $0xa8] sm:$0xff]  ;;  %s4135_s19 = smul.u32 40, %s5734_s28  ;;  %4145 = vset.pattern.permute.xlu0 %v4272_v26  ;;  %vm1115_vm1 = vcmask 130048   ;;  %vm1298_vm2 = vcmask 392192  }
  0x10   : > { %v3971_v2 = vld [vmem:[%s5711_s3 + $0xf8] sm:$0xff]  ;;  %982 = vmatpush.bf16.msra.mxu2 %v3963_v1  ;;  %v3970_v6 = vld [vmem:[%s5711_s3 + $0xf0] sm:$0xff]  ;;  %v3969_v10 = vld [vmem:[%s5711_s3 + $0xe8] sm:$0xff]  ;;  %4146 = vset.pattern.permute.xlu1 %v4272_v26  ;;  %s3927_s0 = sshll.u32 %s5734_s28, 4 }
  0x11   : > { %v3955_v3 = vld [vmem:[%s5711_s3 + $0x78] sm:$0xff]  ;;  %996 = vmatpush.bf16.msra.mxu3 %v3971_v2  ;;  %v3954_v7 = vld [vmem:[%s5711_s3 + $0x70] sm:$0xff]  ;;  %v3953_v11 = vld [vmem:[%s5711_s3 + $0x68] sm:$0xff]  ;;  %s4464_s20 = scalar_lea.vmem %s5730_s1, %s4135_s19  ;;  %4147 = vset.pattern.permute.xlu2 %v4272_v26  ;;  %s3926_s1 = sshll.u32 %s5734_s28, 5 }
  0x12   : > { %968 = vmatpush.bf16.msra.mxu1 %v3955_v3  ;;  %v3944_v12 = vld [vmem:[%s5711_s3 + $0x20] sm:$0xff]  ;;  %v3943_v16 = vld [vmem:[%s5711_s3 + $0x18] sm:$0xff]  ;;  %v3942_v20 = vld [vmem:[%s5711_s3 + $0x10] sm:$0xff]  ;;  %s605_s23 = scalar_lea.vmem %s5731_s2, %s3926_s1  ;;  %s4879_s2 = scalar_lea.vmem %s5732_s22, %s3927_s0 }
  0x13   : > { %955 = vmatpush.bf16.msra.mxu0 %v3946_v4  ;;  %v3960_v13 = vld [vmem:[%s5711_s3 + $0xa0] sm:$0xff]  ;;  %v3959_v17 = vld [vmem:[%s5711_s3 + $0x98] sm:$0xff]  ;;  %v3958_v21 = vld [vmem:[%s5711_s3 + $0x90] sm:$0xff]  ;;  %s3928_s1 = sshll.u32 %s5734_s28, 6 }
  0x14   : > { %983 = vmatpush.bf16.msra.mxu2 %v3962_v5  ;;  %v3968_v14 = vld [vmem:[%s5711_s3 + $0xe0] sm:$0xff]  ;;  %v3967_v18 = vld [vmem:[%s5711_s3 + $0xd8] sm:$0xff]  ;;  %v1037_v23 = vld [vmem:[%s5714_s6 + $0x10] sm:$0xff] }
  0x15   : > { %997 = vmatpush.bf16.msra.mxu3 %v3970_v6  ;;  %v3952_v15 = vld [vmem:[%s5711_s3 + $0x60] sm:$0xff]  ;;  %v3951_v19 = vld [vmem:[%s5711_s3 + $0x58] sm:$0xff]  ;;  %v3966_v24 = vld [vmem:[%s5711_s3 + $0xd0] sm:$0xff]  ;;  %1056 = vperm.xlu1 %4146, %v1037_v23  }
  0x16   : > { %969 = vmatpush.bf16.msra.mxu1 %v3954_v7  ;;  %v1035_v22 = vld [vmem:[%s5714_s6] sm:$0xff]  ;;  %v3950_v25 = vld [vmem:[%s5711_s3 + $0x50] sm:$0xff]  ;;  %v3941_v27 = vld [vmem:[%s5711_s3 + $0x8] sm:$0xff] }
  0x17   : > { %956 = vmatpush.bf16.msra.mxu0 %v3945_v8  ;;  %1046 = vperm.xlu0 %4145, %v1035_v22   ;;  %v3957_v28 = vld [vmem:[%s5711_s3 + $0x88] sm:$0xff]  ;;  %v3940_v31 = vld [vmem:[%s5711_s3] sm:$0xff]  ;;  %v3931_v36 = vld [vmem:[%s4464_s20 + $0x10] sm:$0xf0] }
  0x18   : > { %984 = vmatpush.bf16.msra.mxu2 %v3961_v9  ;;  %v3965_v29 = vld [vmem:[%s5711_s3 + $0xc8] sm:$0xff]  ;;  %v3956_v32 = vld [vmem:[%s5711_s3 + $0x80] sm:$0xff]  ;;  %v3932_v38 = vld [vmem:[%s4464_s20 + $0x18] sm:$0xf0] }
  0x19   : > { %998 = vmatpush.bf16.msra.mxu3 %v3969_v10  ;;  %v3949_v30 = vld [vmem:[%s5711_s3 + $0x48] sm:$0xff]  ;;  %v3075_v33 = vld [vmem:[%s4464_s20] sm:$0xf]  ;;  %v1038_v41 = vld [vmem:[%s5714_s6 + $0x18] sm:$0xff] }
  0x1a   : > { %970 = vmatpush.bf16.msra.mxu1 %v3953_v11  ;;  %v3964_v34 = vld [vmem:[%s5711_s3 + $0xc0] sm:$0xff]  ;;  %v3083_v37 = vld [vmem:[%s4464_s20 + $0x8] sm:$0xf]  ;;  %v3930_v39 = vld [vmem:[%s4464_s20 + $0xc] sm:$0xf]  ;;  %v3076_v46 = vor.u32 %v3931_v36, %v3075_v33 }
  0x1b   : > { %957 = vmatpush.bf16.msra.mxu0 %v3944_v12  ;;  %v3948_v35 = vld [vmem:[%s5711_s3 + $0x40] sm:$0xff]  ;;  %v1036_v40 = vld [vmem:[%s5714_s6 + $0x8] sm:$0xff]  ;;  %v3077_v44 = vld [vmem:[%s4464_s20 + $0x14] sm:$0xf0]  ;;  %v3084_v47 = vor.u32 %v3932_v38, %v3083_v37 }
  0x1c   : > { %985 = vmatpush.bf16.msra.mxu2 %v3960_v13  ;;  %v3085_v42 = vld [vmem:[%s4464_s20 + $0x1c] sm:$0xf0]  ;;  %v3929_v43 = vld [vmem:[%s4464_s20 + $0x4] sm:$0xf]  ;;  %v3975_v45 = vld [vmem:[%s5711_s3 + $0x118] sm:$0xff] }
  0x1d   : > { %999 = vmatpush.bf16.msra.mxu3 %v3968_v14  ;;  %1061 = vperm.xlu1 %4146, %v1038_v41   ;;  %v3088_v48 = vor.u32 %v3930_v39, %v3085_v42  ;;  %v3080_v49 = vor.u32 %v3929_v43, %v3077_v44  ;;  %v3974_v50 = vld [vmem:[%s5711_s3 + $0x110] sm:$0xff]  ;;  %v1042_v52 = vld [vmem:[%s5714_s6 + $0x38] sm:$0xff]  ;;  %v3973_v53 = vld [vmem:[%s5711_s3 + $0x108] sm:$0xff] }
  0x1e   : > { %971 = vmatpush.bf16.msra.mxu1 %v3952_v15  ;;  %v1041_v51 = vld [vmem:[%s5714_s6 + $0x30] sm:$0xff]  ;;  %v1039_v54 = vld [vmem:[%s5714_s6 + $0x20] sm:$0xff]  ;;  %v1397_v58 = vld [vmem:[%s5720_s12 + $0x8] sm:$0xff] }
  0x1f   : > { %958 = vmatpush.bf16.msra.mxu0 %v3943_v16  ;;  %1051 = vperm.xlu0 %4145, %v1036_v40   ;;  %v3972_v55 = vld [vmem:[%s5711_s3 + $0x100] sm:$0xff]  ;;  %v3091_v56 = vld [vmem:[%s4464_s20 + $0x10] sm:$0xf]  ;;  %v1401_v62 = vld [vmem:[%s5720_s12 + $0x28] sm:$0xff] }
  0x20   : > { %986 = vmatpush.bf16.msra.mxu2 %v3959_v17  ;;  %1066 = vperm.xlu2 %4147, %v1039_v54   ;;  %v3933_v57 = vld [vmem:[%s4464_s20 + $0x20] sm:$0xf0]  ;;  %v1398_v59 = vld [vmem:[%s5720_s12 + $0x10] sm:$0xff]  ;;  %v1403_v63 = vld [vmem:[%s5720_s12 + $0x38] sm:$0xff] }
  0x21   : > { %1000 = vmatpush.bf16.msra.mxu3 %v3967_v18  ;;  %v3092_v60 = vor.u32 %v3933_v57, %v3091_v56  ;;  %v1400_v61 = vld [vmem:[%s5720_s12 + $0x20] sm:$0xff]  ;;  %v1405_v0 = vld [vmem:[%s5720_s12 + $0x48] sm:$0xff]  ;;  %v1414_v1 = vld [vmem:[%s5720_s12 + $0x90] sm:$0xff] }
  0x22   : > { %972 = vmatpush.bf16.msra.mxu1 %v3951_v19  ;;  %v1040_v2 = vld [vmem:[%s5714_s6 + $0x28] sm:$0xff]  ;;  %v1404_v3 = vld [vmem:[%s5720_s12 + $0x40] sm:$0xff]  ;;  %v1399_v8 = vld [vmem:[%s5720_s12 + $0x18] sm:$0xff] }
  0x23   : > { %959 = vmatpush.bf16.msra.mxu0 %v3942_v20  ;;  %v1408_v4 = vld [vmem:[%s5720_s12 + $0x60] sm:$0xff]  ;;  %v1413_v6 = vld [vmem:[%s5720_s12 + $0x88] sm:$0xff]  ;;  %v1407_v9 = vld [vmem:[%s5720_s12 + $0x58] sm:$0xff] }
  0x24   : > { %987 = vmatpush.bf16.msra.mxu2 %v3958_v21  ;;  %v1396_v5 = vld [vmem:[%s5720_s12] sm:$0xff]  ;;  %v1417_v7 = vld [vmem:[%s5720_s12 + $0xa8] sm:$0xff]  ;;  %v1411_v10 = vld [vmem:[%s5720_s12 + $0x78] sm:$0xff] }
  0x25   : > { %1001 = vmatpush.bf16.msra.mxu3 %v3966_v24  ;;  %1081 = vperm.xlu1 %4146, %v1042_v52   ;;  %v1402_v11 = vld [vmem:[%s5720_s12 + $0x30] sm:$0xff]  ;;  %v1416_v12 = vld [vmem:[%s5720_s12 + $0xa0] sm:$0xff]  ;;  %v1421_v13 = vld [vmem:[%s5720_s12 + $0xc8] sm:$0xff] }
  0x26   : > { %973 = vmatpush.bf16.msra.mxu1 %v3950_v25  ;;  %v1412_v15 = vld [vmem:[%s5720_s12 + $0x80] sm:$0xff]  ;;  %v1410_v16 = vld [vmem:[%s5720_s12 + $0x70] sm:$0xff]  ;;  %v1419_v23 = vld [vmem:[%s5720_s12 + $0xb8] sm:$0xff] }
  0x27   : > { %960 = vmatpush.bf16.msra.mxu0 %v3941_v27  ;;  %1076 = vperm.xlu0 %4145, %v1041_v51   ;;  %v1424_v17 = vld [vmem:[%s5720_s12 + $0xe0] sm:$0xff]  ;;  %v1406_v22 = vld [vmem:[%s5720_s12 + $0x50] sm:$0xff]  ;;  %v1427_v24 = vld [vmem:[%s5720_s12 + $0xf8] sm:$0xff] }
  0x28   : > { %988 = vmatpush.bf16.msra.mxu2 %v3957_v28  ;;  %1071 = vperm.xlu2 %4147, %v1040_v2   ;;  %v4260_v20 = vld [vmem:[%s5712_s4] ss:$0 sm:$0xff]  ;;  %v1409_v43 = vld [vmem:[%s5720_s12 + $0x68] sm:$0xff]  ;;  %v1423_v52 = vld [vmem:[%s5720_s12 + $0xd8] sm:$0xff] }
  0x29   : > { %1002 = vmatpush.bf16.msra.mxu3 %v3965_v29  ;;  %v1425_v44 = vld [vmem:[%s5720_s12 + $0xe8] sm:$0xff]  ;;  %v3978_v54 = vld [vmem:[%s5713_s5 + $0x10] sm:$0xff]  ;;  %v3979_v56 = vld [vmem:[%s5713_s5 + $0x18] sm:$0xff] }
  0x2a   : > { %974 = vmatpush.bf16.msra.mxu1 %v3949_v30  ;;  %v3977_v51 = vld [vmem:[%s5713_s5 + $0x8] sm:$0xff]  ;;  %v3990_v57 = vld [vmem:[%s5717_s9 + $0x38] sm:$0xff]  ;;  %v3934_v2 = vld [vmem:[%s605_s23] sm:$0xff] }
  0x2b   : > { %961 = vmatpush.bf16.msra.mxu0 %v3940_v31 }
  0x2c   : > { %989 = vmatpush.bf16.msra.mxu2 %v3956_v32 }
  0x2d   : > { %1003 = vmatpush.bf16.msra.mxu3 %v3964_v34  ;;  %1441 = vperm.xlu1 %4146, %v1398_v59   ;;  %v1415_v34 = vld [vmem:[%s5720_s12 + $0x98] sm:$0xff]  ;;  %v3988_v59 = vld [vmem:[%s5717_s9 + $0x28] sm:$0xff] }
  0x2e   : > { %975 = vmatpush.bf16.msra.mxu1 %v3948_v35  ;;  %962 = vmatmul.bf16.vlgmr.msra.gmra.mxu0 %v3076_v46  ;;  %v1422_v35 = vld [vmem:[%s5720_s12 + $0xd0] sm:$0xff] }
  0x2f   : > { %1014 = vmatpush.bf16.msrb.mxu0 %v3975_v45  ;;  %990 = vmatmul.bf16.vlgmr.msra.gmra.mxu2 %v3084_v47 }
  0x30   : > { %1004 = vmatmul.bf16.vlgmr.msra.gmra.mxu3 %v3088_v48  ;;  %1436 = vperm.xlu0 %4145, %v1397_v58   ;;  %v3976_v48 = vld [vmem:[%s5713_s5] sm:$0xff]  ;;  %v3989_v58 = vld [vmem:[%s5717_s9 + $0x30] sm:$0xff] }
  0x31   : > { %976 = vmatmul.bf16.vlgmr.msra.gmra.mxu1 %v3080_v49  ;;  %1431 = vperm.xlu2 %4147, %v1396_v5   ;;  %v1418_v49 = vld [vmem:[%s5720_s12 + $0xb0] sm:$0xff]  ;;  %v3935_v5 = vld [vmem:[%s605_s23 + $0x8] sm:$0xff] }
  0x32   : > { %1231 = vmatpush.bf16.msrb.mxu2 %v3990_v57 }
  0x33   : > { %1015 = vmatpush.bf16.msrb.mxu0 %v3974_v50  ;;  %v1420_v50 = vld [vmem:[%s5720_s12 + $0xc0] sm:$0xff] }
  0x35   : > { %1456 = vperm.xlu1 %4146, %v1401_v62   ;;  %v3986_v62 = vld [vmem:[%s5717_s9 + $0x18] sm:$0xff] }
  0x36   : > { %1232 = vmatpush.bf16.msrb.mxu2 %v3989_v58 }
  0x37   : > { %1016 = vmatpush.bf16.msrb.mxu0 %v3973_v53  ;;  %v1426_v53 = vld [vmem:[%s5720_s12 + $0xf0] sm:$0xff] }
  0x38   : > { %1451 = vperm.xlu0 %4145, %v1400_v61   ;;  %v3987_v61 = vld [vmem:[%s5717_s9 + $0x20] sm:$0xff] }
  0x39   : > { %1446 = vperm.xlu2 %4147, %v1399_v8   ;;  %v4261_v8 = vld [vmem:[%s5715_s7] ss:$0 sm:$0xff] }
  0x3a   : > { %1233 = vmatpush.bf16.msrb.mxu2 %v3988_v59 }
  0x3b   : > { %1017 = vmatpush.bf16.msrb.mxu0 %v3972_v55  ;;  %v1988_v55 = vld [vmem:[%s5724_s16] sm:$0xff] }
  0x3d   : > { %1471 = vperm.xlu1 %4146, %v1404_v3   ;;  %v3984_v3 = vld [vmem:[%s5717_s9 + $0x8] sm:$0xff] }
  0x3e   : > { %3237 = vmatmul.msk.bf16.vlgmr.msrb.gmra.mxu0 %vm950_vm0, %v3092_v60  ;;  %v3982_v60 = vld [vmem:[%s5716_s8 + $0x10] sm:$0xff]  ;;  %1234 = vmatpush.bf16.msrb.mxu2 %v3987_v61  ;;  %v4263_v61 = vld [vmem:[%s5718_s10] ss:$0 sm:$0xff] }
  0x3f   : > { %1316 = vmatpush.bf16.msrb.mxu3 %v3982_v60 }
  0x40   : > { %1466 = vperm.xlu0 %4145, %v1403_v63   ;;  %v3981_v63 = vld [vmem:[%s5716_s8 + $0x8] sm:$0xff] }
  0x41   : > { %1461 = vperm.xlu2 %4147, %v1402_v11  }
  0x42   : > { %1235 = vmatpush.bf16.msrb.mxu2 %v3986_v62 }
  0x43   : > { %1317 = vmatpush.bf16.msrb.mxu3 %v3981_v63 }
  0x45   : > { %1516 = vperm.xlu1 %4146, %v1413_v6  }
  0x48   : > { %1476 = vperm.xlu0 %4145, %v1405_v0   ;;  %v3985_v0 = vld [vmem:[%s5717_s9 + $0x10] sm:$0xff] }
  0x49   : > { %1511 = vperm.xlu2 %4147, %v1412_v15   ;;  %1236 = vmatpush.bf16.msrb.mxu2 %v3985_v0 }
  0x4d   : > { %1486 = vperm.xlu1 %4146, %v1407_v9   ;;  %1237 = vmatpush.bf16.msrb.mxu2 %v3984_v3  ;;  %v3936_v9 = vld [vmem:[%s605_s23 + $0x10] sm:$0xff] }
  0x50   : > { %1521 = vperm.xlu0 %4145, %v1414_v1   ;;  %v3980_v1 = vld [vmem:[%s5716_s8] sm:$0xff] }
  0x51   : > { %1481 = vperm.xlu2 %4147, %v1406_v22   ;;  %1318 = vmatpush.bf16.msrb.mxu3 %v3980_v1 }
  0x54   : > { %3318 = vmatmul.msk.bf16.vlgmr.msrb.gmra.mxu3 %vm1298_vm2, %v3934_v2 }
  0x55   : > { %1531 = vperm.xlu1 %4146, %v1416_v12  }
  0x58   : > { %1491 = vperm.xlu0 %4145, %v1408_v4   ;;  %v3983_v4 = vld [vmem:[%s5717_s9] sm:$0xff] }
  0x59   : > { %1526 = vperm.xlu2 %4147, %v1415_v34   ;;  %1238 = vmatpush.bf16.msrb.mxu2 %v3983_v4 }
  0x5d   : > { %1501 = vperm.xlu1 %4146, %v1410_v16  }
  0x60   : > { %1536 = vperm.xlu0 %4145, %v1417_v7  }
  0x61   : > { %1496 = vperm.xlu2 %4147, %v1409_v43  }
  0x64   : > { %3319 = vmatmul.msk.bf16.gmra.mxu3 %vm1298_vm2, %v3935_v5 }
  0x65   : > { %1546 = vperm.xlu1 %4146, %v1419_v23  }
  0x68   : > { %1506 = vperm.xlu0 %4145, %v1411_v10  }
  0x69   : > { %1541 = vperm.xlu2 %4147, %v1418_v49  }
  0x6d   : > { %1561 = vperm.xlu1 %4146, %v1422_v35  }
  0x70   : > { %1556 = vperm.xlu0 %4145, %v1421_v13  }
  0x71   : > { %1551 = vperm.xlu2 %4147, %v1420_v50  }
  0x74   : > { %3320 = vmatmul.msk.bf16.gmra.mxu3 %vm1298_vm2, %v3936_v9 }
  0x75   : > { %1576 = vperm.xlu1 %4146, %v1425_v44  }
  0x78   : > { %1571 = vperm.xlu0 %4145, %v1424_v17  }
  0x79   : > { %1566 = vperm.xlu2 %4147, %v1423_v52  }
  0x80   : > { %1586 = vperm.xlu0 %4145, %v1427_v24  }
  0x81   : > { %1581 = vperm.xlu2 %4147, %v1426_v53  }
  0x87   : > { %v1057_v17 = vpop.permute.xlu1 %1056 }
  0x89   : > { %1991 = vperm.xlu2 %4147, %v1988_v55   ;;  %v1047_v6 = vpop.permute.xlu0 %1046 }
  0x8a   : > { %v1087_v10 = vmul.f32 %v4261_v8, %v1047_v6 }
  0x91   : > { %v1052_v11 = vpop.permute.xlu0 %1051 }
  0x92   : > { %v1088_v12 = vmul.f32 %v4261_v8, %v1052_v11 }
  0xab   : > { %v963_v14 = vpop.f32.mrf.mxu0 }
  0xac   : > { %v964_v25 = vadd.f32 %v4260_v20, %v963_v14 }
  0xae   : > { %v977_v18 = vpop.f32.mrf.mxu1 }
  0xaf   : > { %v978_v29 = vadd.f32 %v977_v18, %v964_v25 }
  0xb2   : > { %v991_v19 = vpop.f32.mrf.mxu2 }
  0xb3   : > { %v965_v21 = vpop.f32.mrf.mxu0  ;;  %v1005_v26 = vpop.f32.mrf.mxu3  ;;  %v992_v32 = vadd.f32 %v991_v19, %v978_v29  ;;  %v3937_v19 = vld [vmem:[%s605_s23 + $0x18] sm:$0xff]  ;;  %s5695_s23 = scalar_lea.vmem %s5726_s18, %s3928_s1 }
  0xb4   : > { %v966_v27 = vadd.f32 %v4260_v20, %v965_v21  ;;  %v1089_v20 = vmul.f32 %v4261_v8, %v1057_v17  ;;  %v1062_v21 = vpop.permute.xlu1 %1061  ;;  %3321 = vmatmul.msk.bf16.gmra.mxu3 %vm1298_vm2, %v3937_v19 }
  0xb5   : > { %v1006_v37 = vadd.f32 %v1005_v26, %v992_v32  ;;  %v1090_v22 = vmul.f32 %v4261_v8, %v1062_v21 }
  0xb6   : > { %v979_v28 = vpop.f32.mrf.mxu1 }
  0xb7   : > { %v980_v33 = vadd.f32 %v979_v28, %v966_v27  ;;  %v1067_v27 = vpop.permute.xlu2 %1066 }
  0xb8   : > { %v1091_v29 = vmul.f32 %v4261_v8, %v1067_v27  ;;  %v3992_v27 = vld [vmem:[%s5719_s11 + $0x8] sm:$0xff] }
  0xba   : > { %v993_v30 = vpop.f32.mrf.mxu2 }
  0xbb   : > { %v1019_v31 = vpop.f32.mrf.mxu0  ;;  %v994_v36 = vadd.f32 %v993_v30, %v980_v33  ;;  %v1007_v38 = vpop.f32.mrf.mxu3 }
  0xbc   : > { %v1020_v40 = vadd.f32 %v1019_v31, %v1006_v37  ;;  %v1077_v37 = vpop.permute.xlu0 %1076 }
  0xbd   : > { %v1008_v39 = vadd.f32 %v1007_v38, %v994_v36  ;;  %v1082_v38 = vpop.permute.xlu1 %1081 }
  0xbe   : > { %v1024_v45 = vmax.f32 %v1020_v40, 0.0  ;;  %v1094_v40 = vmul.f32 %v4261_v8, %v1082_v38 }
  0xbf   : > { %v1072_v30 = vpop.permute.xlu2 %1071 }
  0xc0   : > { %v1092_v31 = vmul.f32 %v4261_v8, %v1072_v30  ;;  %v3995_v30 = vld [vmem:[%s5719_s11 + $0x20] sm:$0xff] }
  0xc3   : > { %v1021_v41 = vpop.f32.mrf.mxu0 }
  0xc4   : > { %v1022_v42 = vadd.f32 %v1021_v41, %v1008_v39  ;;  %v1093_v39 = vmul.f32 %v4261_v8, %v1077_v37  ;;  %v4000_v37 = vld [vmem:[%s5719_s11 + $0x48] sm:$0xff] }
  0xc6   : > { %v1025_v46 = vmax.f32 %v1022_v42, 0.0 }
  0xc8   : > { %v1034_v47 = vpack.c.bf16 %v1025_v46, %v1024_v45 }
  0xca   : > { %1135 = vmatpush.bf16.msrb.mxu1 %v1034_v47 }
  0xcd   : > { %3254 = vmatmul.msk.bf16.vlgmr.msrb.gmra.mxu1 %vm1115_vm1, %v3976_v48 }
  0xd7   : > { %v1320_v45 = vpop.f32.mrf.mxu3 }
  0xdd   : > { %3255 = vmatmul.msk.bf16.gmra.mxu1 %vm1115_vm1, %v3977_v51 }
  0xdf   : > { %v1322_v46 = vpop.f32.mrf.mxu3 }
  0xe7   : > { %v1325_v49 = vpop.f32.mrf.mxu3 }
  0xed   : > { %3256 = vmatmul.msk.bf16.gmra.mxu1 %vm1115_vm1, %v3978_v54 }
  0xef   : > { %v1327_v52 = vpop.f32.mrf.mxu3 }
  0xf7   : > { %v1330_v54 = vpop.f32.mrf.mxu3 }
  0xfd   : > { %3257 = vmatmul.msk.bf16.gmra.mxu1 %vm1115_vm1, %v3979_v56 }
  0xff   : > { %v1332_v56 = vpop.f32.mrf.mxu3 }
 0x137   : > { %v1335_v58 = vpop.f32.mrf.mxu3 }
 0x13f   : > { %v1337_v63 = vpop.f32.mrf.mxu3 }
 0x14a   : > { %v1137_v7 = vpop.f32.mrf.mxu1 }
 0x14b   : > { %v1138_v14 = vadd.f32 %v1137_v7, %v1087_v10 }
 0x152   : > { %v1139_v13 = vpop.f32.mrf.mxu1 }
 0x153   : > { %v1140_v15 = vadd.f32 %v1139_v13, %v1088_v12 }
 0x155   : > { %v1163_v16 = vpack.c.bf16 %v1140_v15, %v1138_v14 }
 0x157   : > { %1239 = vmatmul.bf16.vlgmr.msrb.gmra.mxu2 %v1163_v16 }
 0x15a   : > { %v1142_v18 = vpop.f32.mrf.mxu1 }
 0x15b   : > { %v1143_v24 = vadd.f32 %v1142_v18, %v1089_v20 }
 0x162   : > { %v1144_v23 = vpop.f32.mrf.mxu1 }
 0x163   : > { %v1145_v25 = vadd.f32 %v1144_v23, %v1090_v22 }
 0x165   : > { %v1164_v26 = vpack.c.bf16 %v1145_v25, %v1143_v24 }
 0x167   : > { %1244 = vmatmul.bf16.gmra.mxu2 %v1164_v26  ;;  %v3991_v26 = vld [vmem:[%s5719_s11] sm:$0xff] }
 0x16a   : > { %v1147_v28 = vpop.f32.mrf.mxu1 }
 0x16b   : > { %v1148_v33 = vadd.f32 %v1147_v28, %v1091_v29  ;;  %v3993_v28 = vld [vmem:[%s5719_s11 + $0x10] sm:$0xff]  ;;  %v3994_v29 = vld [vmem:[%s5719_s11 + $0x18] sm:$0xff] }
 0x172   : > { %v1149_v32 = vpop.f32.mrf.mxu1 }
 0x173   : > { %v1150_v34 = vadd.f32 %v1149_v32, %v1092_v31  ;;  %v3996_v31 = vld [vmem:[%s5719_s11 + $0x28] sm:$0xff]  ;;  %v3997_v32 = vld [vmem:[%s5719_s11 + $0x30] sm:$0xff] }
 0x175   : > { %v1165_v35 = vpack.c.bf16 %v1150_v34, %v1148_v33  ;;  %v3998_v33 = vld [vmem:[%s5719_s11 + $0x38] sm:$0xff]  ;;  %v3999_v34 = vld [vmem:[%s5719_s11 + $0x40] sm:$0xff] }
 0x177   : > { %1249 = vmatmul.bf16.gmra.mxu2 %v1165_v35 }
 0x17a   : > { %v1152_v36 = vpop.f32.mrf.mxu1 }
 0x17b   : > { %v1153_v42 = vadd.f32 %v1152_v36, %v1093_v39 }
 0x182   : > { %v1154_v41 = vpop.f32.mrf.mxu1 }
 0x183   : > { %v1155_v43 = vadd.f32 %v1154_v41, %v1094_v40  ;;  %v4001_v40 = vld [vmem:[%s5719_s11 + $0x50] sm:$0xff] }
 0x185   : > { %v1166_v44 = vpack.c.bf16 %v1155_v43, %v1153_v42  ;;  %v1432_v42 = vpop.permute.xlu2 %1431  ;;  %v1437_v43 = vpop.permute.xlu0 %1436 }
 0x187   : > { %1254 = vmatmul.bf16.gmra.mxu2 %v1166_v44 }
 0x1da   : > { %v1240_v47 = vpop.f32.mrf.mxu2 }
 0x1db   : > { %v1321_v48 = vadd.f32 %v1320_v45, %v1240_v47  ;;  %v4752_v45 = vpop.permute.xlu1 %1441  ;;  %v4757_v47 = vpop.permute.xlu2 %1446 }
 0x1dd   : > { %v1344_v20 = vadd.f32 %v4263_v61, %v1321_v48 }
 0x1df   : > { %v1352_v24 = vmax.f32 %v1344_v20, 0.0 }
 0x1e2   : > { %v1242_v50 = vpop.f32.mrf.mxu2 }
 0x1e3   : > { %v1323_v11 = vadd.f32 %v1322_v46, %v1242_v50  ;;  %v4002_v46 = vld [vmem:[%s5719_s11 + $0x58] sm:$0xff]  ;;  %v4764_v50 = vpop.permute.xlu1 %1456 }
 0x1e5   : > { %v1345_v17 = vadd.f32 %v4263_v61, %v1323_v11 }
 0x1e7   : > { %v1353_v22 = vmax.f32 %v1345_v17, 0.0 }
 0x1e9   : > { %v1392_v25 = vpack.c.bf16 %v1353_v22, %v1352_v24 }
 0x1ea   : > { %v1245_v51 = vpop.f32.mrf.mxu2 }
 0x1eb   : > { %v1326_v7 = vadd.f32 %v1325_v49, %v1245_v51  ;;  %v4761_v49 = vpop.permute.xlu0 %1451 }
 0x1ed   : > { %v1346_v15 = vadd.f32 %v4263_v61, %v1326_v7 }
 0x1ef   : > { %v1354_v21 = vmax.f32 %v1346_v15, 0.0  ;;  %v4005_v15 = vld [vmem:[%s5719_s11 + $0x70] sm:$0xff] }
 0x1f2   : > { %v1247_v53 = vpop.f32.mrf.mxu2 }
 0x1f3   : > { %v1328_v4 = vadd.f32 %v1327_v52, %v1247_v53  ;;  %v4768_v52 = vpop.permute.xlu2 %1461  ;;  %v4770_v53 = vpop.permute.xlu0 %1466 }
 0x1f5   : > { %v1347_v12 = vadd.f32 %v4263_v61, %v1328_v4  ;;  %v4004_v4 = vld [vmem:[%s5719_s11 + $0x68] sm:$0xff] }
 0x1f7   : > { %v1355_v18 = vmax.f32 %v1347_v12, 0.0 }
 0x1f9   : > { %v1393_v23 = vpack.c.bf16 %v1355_v18, %v1354_v21 }
 0x1fa   : > { %v1250_v55 = vpop.f32.mrf.mxu2 }
 0x1fb   : > { %v1331_v1 = vadd.f32 %v1330_v54, %v1250_v55  ;;  %v4775_v54 = vld [vmem:[%s5721_s13] ss:$0 sm:$0xff]  ;;  %v1472_v55 = vpop.permute.xlu1 %1471 }
 0x1fd   : > { %v1348_v8 = vadd.f32 %v4263_v61, %v1331_v1 }
 0x1ff   : > { %v1356_v16 = vmax.f32 %v1348_v8, 0.0 }
 0x202   : > { %v1252_v57 = vpop.f32.mrf.mxu2 }
 0x203   : > { %v1333_v62 = vadd.f32 %v1332_v56, %v1252_v57  ;;  %v1600_v56 = vmul.f32 %v4775_v54, %v1472_v55  ;;  %v4003_v57 = vld [vmem:[%s5719_s11 + $0x60] sm:$0xff]  ;;  %v1517_v1 = vpop.permute.xlu1 %1516 }
 0x205   : > { %v1349_v5 = vadd.f32 %v4263_v61, %v1333_v62 }
 0x207   : > { %v1357_v13 = vmax.f32 %v1349_v5, 0.0 }
 0x209   : > { %v1394_v19 = vpack.c.bf16 %v1357_v13, %v1356_v16 }
 0x20a   : > { %v1255_v59 = vpop.f32.mrf.mxu2 }
 0x20b   : > { %v1336_v60 = vadd.f32 %v1335_v58, %v1255_v59  ;;  %v1487_v8 = vpop.permute.xlu1 %1486 }
 0x20d   : > { %v1350_v2 = vadd.f32 %v4263_v61, %v1336_v60  ;;  %v1512_v60 = vpop.permute.xlu2 %1511 }
 0x20f   : > { %v1358_v9 = vmax.f32 %v1350_v2, 0.0 }
 0x212   : > { %v1257_v0 = vpop.f32.mrf.mxu2 }
 0x213   : > { %v1338_v3 = vadd.f32 %v1337_v63, %v1257_v0  ;;  %v1532_v18 = vpop.permute.xlu1 %1531 }
 0x215   : > { %v1351_v6 = vadd.f32 %v4263_v61, %v1338_v3  ;;  %v1477_v61 = vpop.permute.xlu0 %1476  ;;  %v1482_v2 = vpop.permute.xlu2 %1481 }
 0x216   : > { %v1601_v62 = vmul.f32 %v4775_v54, %v1477_v61  ;;  %v1602_v3 = vmul.f32 %v4775_v54, %v1482_v2 }
 0x217   : > { %v1359_v10 = vmax.f32 %v1351_v6, 0.0 }
 0x219   : > { %v1395_v14 = vpack.c.bf16 %v1359_v10, %v1358_v9  ;;  %v1603_v9 = vmul.f32 %v4775_v54, %v1487_v8 }
 0x21b   : > { %1756 = vmatpush.bf16.msra.mxu0 %v1395_v14 }
 0x21d   : > { %v1522_v7 = vpop.permute.xlu0 %1521  ;;  %v1527_v12 = vpop.permute.xlu2 %1526 }
 0x21f   : > { %1757 = vmatpush.bf16.msra.mxu0 %v1394_v19 }
 0x223   : > { %1758 = vmatpush.bf16.msra.mxu0 %v1393_v23  ;;  %v1502_v23 = vpop.permute.xlu1 %1501 }
 0x224   : > { %v1606_v24 = vmul.f32 %v4775_v54, %v1502_v23 }
 0x225   : > { %v1492_v13 = vpop.permute.xlu0 %1491  ;;  %v1497_v19 = vpop.permute.xlu2 %1496 }
 0x226   : > { %v1604_v14 = vmul.f32 %v4775_v54, %v1492_v13  ;;  %v1605_v20 = vmul.f32 %v4775_v54, %v1497_v19 }
 0x227   : > { %1759 = vmatpush.bf16.msra.mxu0 %v1392_v25  ;;  %v4006_v25 = vld [vmem:[%s5719_s11 + $0x78] sm:$0xff] }
 0x22a   : > { %3386 = vmatmul.msk.bf16.vlgmr.msra.gmra.mxu0 %vm950_vm0, %v3991_v26 }
 0x23a   : > { %3387 = vmatmul.msk.bf16.gmra.mxu0 %vm950_vm0, %v3992_v27 }
 0x24a   : > { %3388 = vmatmul.msk.bf16.gmra.mxu0 %vm950_vm0, %v3993_v28 }
 0x25a   : > { %3389 = vmatmul.msk.bf16.gmra.mxu0 %vm950_vm0, %v3994_v29  ;;  %v1592_v29 = vmul.f32 %v4775_v54, %v1432_v42  ;;  %v1594_v42 = vmul.f32 %v4775_v54, %v4752_v45  ;;  %v1596_v45 = vmul.f32 %v4775_v54, %v4761_v49  ;;  %v1542_v49 = vpop.permute.xlu2 %1541 }
 0x26a   : > { %3390 = vmatmul.msk.bf16.gmra.mxu0 %vm950_vm0, %v3995_v30  ;;  %v1608_v30 = vmul.f32 %v4775_v54, %v1512_v60 }
 0x27a   : > { %3391 = vmatmul.msk.bf16.gmra.mxu0 %vm950_vm0, %v3996_v31 }
 0x28a   : > { %3392 = vmatmul.msk.bf16.gmra.mxu0 %vm950_vm0, %v3997_v32 }
 0x29a   : > { %3393 = vmatmul.msk.bf16.gmra.mxu0 %vm950_vm0, %v3998_v33 }
 0x2a7   : > { %v4731_v35 = vpop.f32.mrf.mxu0 }
 0x2a8   : > { %v1762_v32 = vadd.f32 %v4731_v35, %v1592_v29  ;;  %v1552_v29 = vpop.permute.xlu2 %1551 }
 0x2aa   : > { %3394 = vmatmul.msk.bf16.gmra.mxu0 %vm950_vm0, %v3999_v34 }
 0x2af   : > { %v4734_v36 = vpop.f32.mrf.mxu0 }
 0x2b7   : > { %v4739_v38 = vpop.f32.mrf.mxu0 }
 0x2b8   : > { %v1767_v35 = vadd.f32 %v4739_v38, %v1594_v42  ;;  %v1567_v42 = vpop.permute.xlu2 %1566 }
 0x2ba   : > { %3395 = vmatmul.msk.bf16.gmra.mxu0 %vm950_vm0, %v4000_v37  ;;  %v1593_v37 = vmul.f32 %v4775_v54, %v1437_v43  ;;  %v1595_v43 = vmul.f32 %v4775_v54, %v4757_v47  ;;  %v1537_v47 = vpop.permute.xlu0 %1536 }
 0x2bc   : > { %v1764_v55 = vadd.f32 %v4734_v36, %v1593_v37 }
 0x2bf   : > { %v4742_v39 = vpop.f32.mrf.mxu0 }
 0x2c7   : > { %v4747_v41 = vpop.f32.mrf.mxu0 }
 0x2ca   : > { %3396 = vmatmul.msk.bf16.gmra.mxu0 %vm950_vm0, %v4001_v40  ;;  %v1609_v40 = vmul.f32 %v4775_v54, %v1517_v1  ;;  %v1769_v1 = vadd.f32 %v4742_v39, %v1595_v43  ;;  %v1613_v39 = vmul.f32 %v4775_v54, %v1537_v47 }
 0x2cf   : > { %v4750_v44 = vpop.f32.mrf.mxu0 }
 0x2d7   : > { %v4759_v48 = vpop.f32.mrf.mxu0 }
 0x2da   : > { %3397 = vmatmul.msk.bf16.gmra.mxu0 %vm950_vm0, %v4002_v46 }
 0x2df   : > { %v4766_v51 = vpop.f32.mrf.mxu0 }
 0x2e7   : > { %v1781_v58 = vpop.f32.mrf.mxu0 }
 0x2e8   : > { %v4781_v59 = vadd.f32 %v1781_v58, %v1600_v56  ;;  %v1610_v58 = vmul.f32 %v4775_v54, %v1522_v7 }
 0x2ea   : > { %3398 = vmatmul.msk.bf16.gmra.mxu0 %vm950_vm0, %v4003_v57 }
 0x2ef   : > { %v1783_v63 = vpop.f32.mrf.mxu0 }
 0x2f0   : > { %v4785_v0 = vadd.f32 %v1783_v63, %v1601_v62  ;;  %v1611_v63 = vmul.f32 %v4775_v54, %v1527_v12 }
 0x2f7   : > { %v1786_v5 = vpop.f32.mrf.mxu0 }
 0x2f8   : > { %v4791_v6 = vadd.f32 %v1786_v5, %v1602_v3  ;;  %v1772_v5 = vadd.f32 %v4747_v41, %v1596_v45  ;;  %v1614_v41 = vmul.f32 %v4775_v54, %v1542_v49  ;;  %v1582_v45 = vpop.permute.xlu2 %1581 }
 0x2fa   : > { %3399 = vmatmul.msk.bf16.gmra.mxu0 %vm950_vm0, %v4004_v4  ;;  %v1612_v4 = vmul.f32 %v4775_v54, %v1532_v18 }
 0x2ff   : > { %v1788_v10 = vpop.f32.mrf.mxu0 }
 0x300   : > { %v4795_v11 = vadd.f32 %v1788_v10, %v1603_v9  ;;  %v1597_v9 = vmul.f32 %v4775_v54, %v4764_v50  ;;  %v1547_v50 = vpop.permute.xlu1 %1546 }
 0x302   : > { %v1774_v12 = vadd.f32 %v4750_v44, %v1597_v9  ;;  %v1615_v44 = vmul.f32 %v4775_v54, %v1547_v50 }
 0x307   : > { %v1791_v16 = vpop.f32.mrf.mxu0 }
 0x308   : > { %v4801_v17 = vadd.f32 %v1791_v16, %v1604_v14 }
 0x30a   : > { %3400 = vmatmul.msk.bf16.gmra.mxu0 %vm950_vm0, %v4005_v15  ;;  %v1598_v15 = vmul.f32 %v4775_v54, %v4768_v52  ;;  %v1507_v52 = vpop.permute.xlu0 %1506 }
 0x30c   : > { %v1777_v18 = vadd.f32 %v4759_v48, %v1598_v15 }
 0x30f   : > { %v1793_v21 = vpop.f32.mrf.mxu0 }
 0x310   : > { %v4805_v22 = vadd.f32 %v1793_v21, %v1605_v20  ;;  %v1599_v21 = vmul.f32 %v4775_v54, %v4770_v53 }
 0x317   : > { %v1796_v26 = vpop.f32.mrf.mxu0 }
 0x318   : > { %v4811_v27 = vadd.f32 %v1796_v26, %v1606_v24  ;;  %v1779_v24 = vadd.f32 %v4766_v51, %v1599_v21  ;;  %v1562_v51 = vpop.permute.xlu1 %1561 }
 0x31a   : > { %3401 = vmatmul.msk.bf16.gmra.mxu0 %vm950_vm0, %v4006_v25 }
 0x31f   : > { %v4814_v28 = vpop.f32.mrf.mxu0 }
 0x327   : > { %v1801_v31 = vpop.f32.mrf.mxu0 }
 0x328   : > { %v1802_v33 = vadd.f32 %v1801_v31, %v1608_v30  ;;  %v1616_v30 = vmul.f32 %v4775_v54, %v1552_v29 }
 0x32a   : > { %v4148_v34 = vpack.i.bf16 %v1802_v33, %v1762_v32  ;;  %v1557_v33 = vpop.permute.xlu0 %1556 }
 0x32b   : > { %v1617_v53 = vmul.f32 %v4775_v54, %v1557_v33 }
 0x32c   : > { %4149 = vxpose.xlu1.b32.start [1/16] %v4148_v34, 128 }
 0x32f   : > { %v1803_v46 = vpop.f32.mrf.mxu0 }
 0x330   : > { %v1804_v56 = vadd.f32 %v1803_v46, %v1609_v40  ;;  %v1618_v46 = vmul.f32 %v4775_v54, %v1562_v51 }
 0x332   : > { %v4150_v57 = vpack.i.bf16 %v1804_v56, %v1764_v55 }
 0x334   : > { %4151 = vxpose.xlu1.b32.cont [2/16] %v4150_v57, 128 }
 0x337   : > { %v1806_v60 = vpop.f32.mrf.mxu0 }
 0x338   : > { %v1807_v61 = vadd.f32 %v1806_v60, %v1610_v58 }
 0x33a   : > { %v4152_v62 = vpack.i.bf16 %v1807_v61, %v1767_v35  ;;  %v1572_v61 = vpop.permute.xlu0 %1571 }
 0x33c   : > { %4153 = vxpose.xlu1.b32.cont [3/16] %v4152_v62, 128 }
 0x33f   : > { %v1808_v36 = vpop.f32.mrf.mxu0 }
 0x340   : > { %v1809_v2 = vadd.f32 %v1808_v36, %v1611_v63  ;;  %v1577_v36 = vpop.permute.xlu1 %1576 }
 0x342   : > { %v4154_v3 = vpack.i.bf16 %v1809_v2, %v1769_v1 }
 0x344   : > { %4155 = vxpose.xlu1.b32.cont [4/16] %v4154_v3, 128 }
 0x347   : > { %v1811_v38 = vpop.f32.mrf.mxu0 }
 0x348   : > { %v1812_v7 = vadd.f32 %v1811_v38, %v1612_v4 }
 0x34a   : > { %v4156_v8 = vpack.i.bf16 %v1812_v7, %v1772_v5  ;;  %v1587_v7 = vpop.permute.xlu0 %1586 }
 0x34c   : > { %4157 = vxpose.xlu1.b32.cont [5/16] %v4156_v8, 128  ;;  %v1623_v8 = vmul.f32 %v4775_v54, %v1587_v7 }
 0x34f   : > { %v1813_v10 = vpop.f32.mrf.mxu0 }
 0x350   : > { %v1814_v13 = vadd.f32 %v1813_v10, %v1613_v39 }
 0x352   : > { %v4158_v14 = vpack.i.bf16 %v1814_v13, %v1774_v12 }
 0x354   : > { %4159 = vxpose.xlu1.b32.cont [6/16] %v4158_v14, 128 }
 0x357   : > { %v1816_v16 = vpop.f32.mrf.mxu0 }
 0x358   : > { %v1817_v19 = vadd.f32 %v1816_v16, %v1614_v41 }
 0x35a   : > { %v4160_v20 = vpack.i.bf16 %v1817_v19, %v1777_v18 }
 0x35c   : > { %4161 = vxpose.xlu1.b32.cont [7/16] %v4160_v20, 128 }
 0x35f   : > { %v1818_v23 = vpop.f32.mrf.mxu0 }
 0x360   : > { %v1819_v25 = vadd.f32 %v1818_v23, %v1615_v44 }
 0x362   : > { %v4162_v26 = vpack.i.bf16 %v1819_v25, %v1779_v24 }
 0x364   : > { %4163 = vxpose.xlu1.b32.cont [8/16] %v4162_v26, 128 }
 0x367   : > { %v1821_v48 = vpop.f32.mrf.mxu0 }
 0x368   : > { %v1822_v31 = vadd.f32 %v1821_v48, %v1616_v30 }
 0x36a   : > { %v4164_v32 = vpack.i.bf16 %v1822_v31, %v4781_v59  ;;  %v1619_v59 = vmul.f32 %v4775_v54, %v1567_v42 }
 0x36c   : > { %4165 = vxpose.xlu1.b32.cont [9/16] %v4164_v32, 128 }
 0x36f   : > { %v1823_v34 = vpop.f32.mrf.mxu0 }
 0x370   : > { %v1824_v37 = vadd.f32 %v1823_v34, %v1617_v53 }
 0x372   : > { %v4166_v40 = vpack.i.bf16 %v1824_v37, %v4785_v0  ;;  %v1620_v0 = vmul.f32 %v4775_v54, %v1572_v61 }
 0x374   : > { %4167 = vxpose.xlu1.b32.cont [10/16] %v4166_v40, 128 }
 0x377   : > { %v1826_v55 = vpop.f32.mrf.mxu0 }
 0x378   : > { %v1827_v56 = vadd.f32 %v1826_v55, %v1618_v46 }
 0x37a   : > { %v4168_v57 = vpack.i.bf16 %v1827_v56, %v4791_v6  ;;  %v1621_v6 = vmul.f32 %v4775_v54, %v1577_v36 }
 0x37c   : > { %4169 = vxpose.xlu1.b32.cont [11/16] %v4168_v57, 128 }
 0x37f   : > { %v1828_v58 = vpop.f32.mrf.mxu0 }
 0x380   : > { %v1829_v60 = vadd.f32 %v1828_v58, %v1619_v59  ;;  %v3938_v58 = vld [vmem:[%s4879_s2 + $0x4] sm:$0xf] }
 0x382   : > { %v4170_v35 = vpack.i.bf16 %v1829_v60, %v4795_v11  ;;  %v1622_v11 = vmul.f32 %v4775_v54, %v1582_v45  ;;  %v3406_v60 = vld [vmem:[%s4879_s2 + $0x8] sm:$0xf0] }
 0x384   : > { %4171 = vxpose.xlu1.b32.cont [12/16] %v4170_v35, 128 }
 0x387   : > { %v1831_v62 = vpop.f32.mrf.mxu0 }
 0x388   : > { %v1832_v43 = vadd.f32 %v1831_v62, %v1620_v0  ;;  %v3409_v62 = vor.u32 %v3938_v58, %v3406_v60  ;;  %v3542_v58 = vld [vmem:[%s5725_s17 + $0x100] sm:$0xf] }
 0x389   : > { %v4043_v60 = vld [vmem:[%s5725_s17 + $0x11c] sm:$0xf0] }
 0x38a   : > { %v4172_v63 = vpack.i.bf16 %v1832_v43, %v4801_v17  ;;  %v1607_v17 = vmul.f32 %v4775_v54, %v1507_v52  ;;  %1982 = vmatpush.bf16.msra.mxu2 %v3409_v62 }
 0x38c   : > { %4173 = vxpose.xlu1.b32.cont [13/16] %v4172_v63, 128  ;;  %v1799_v9 = vadd.f32 %v4814_v28, %v1607_v17 }
 0x38f   : > { %v1833_v1 = vpop.f32.mrf.mxu0 }
 0x390   : > { %v1834_v2 = vadd.f32 %v1833_v1, %v1621_v6 }
 0x392   : > { %v4174_v3 = vpack.i.bf16 %v1834_v2, %v4805_v22 }
 0x394   : > { %4175 = vxpose.xlu1.b32.cont [14/16] %v4174_v3, 128  ;;  %v4886_v3 = vld [vmem:[%s5722_s14] sm:$0xf] }
 0x395   : > { %3411 = vmatmul.msk.bf16.vlgmr.msra.gmra.mxu2 %vm1115_vm1, %v4886_v3 }
 0x397   : > { %v1836_v4 = vpop.f32.mrf.mxu0 }
 0x398   : > { %v1837_v38 = vadd.f32 %v1836_v4, %v1622_v11 }
 0x39a   : > { %v4176_v5 = vpack.i.bf16 %v1837_v38, %v4811_v27 }
 0x39c   : > { %4177 = vxpose.xlu1.b32.cont [15/16] %v4176_v5, 128 }
 0x39f   : > { %v1838_v47 = vpop.f32.mrf.mxu0 }
 0x3a0   : > { %v1839_v39 = vadd.f32 %v1838_v47, %v1623_v8 }
 0x3a2   : > { %v4178_v10 = vpack.i.bf16 %v1839_v39, %v1799_v9 }
 0x3a4   : > { %4179 = vxpose.xlu1.b32.end [16/16] %v4178_v10, 128 }
 0x3d0   : > { %v4180_v22 = vpop.trf.xlu1 }
 0x3d1   : > { %v4184_v12 = vunpack.i.h.bf16 %v4180_v22  ;;  %v4181_v13 = vunpack.i.l.bf16 %v4180_v22 }
 0x3d8   : > { %v4185_v14 = vpop.trf.xlu1 }
 0x3d9   : > { %v4189_v49 = vunpack.i.h.bf16 %v4185_v14  ;;  %v4186_v15 = vunpack.i.l.bf16 %v4185_v14 }
 0x3db   : > { %v4863_v41 = vpack.c.bf16 %v4186_v15, %v4181_v13  ;;  %v4865_v27 = vpack.c.bf16 %v4189_v49, %v4184_v12  ;;  %v4063_v49 = vld [vmem:[%s5725_s17 + $0x1c4] sm:$0xf] }
 0x3dc   : > { %v3640_v15 = vld [vmem:[%s5725_s17 + $0x1e0] sm:$0xf0] }
 0x3e0   : > { %v4190_v16 = vpop.trf.xlu1 }
 0x3e1   : > { %v4194_v18 = vunpack.i.h.bf16 %v4190_v16  ;;  %v4191_v19 = vunpack.i.l.bf16 %v4190_v16  ;;  %v3643_v16 = vor.u32 %v4063_v49, %v3640_v15  ;;  %v3446_v15 = vld [vmem:[%s5725_s17 + $0x40] sm:$0xf] }
 0x3e3   : > { %2792 = vmatpush.bf16.msrb.mxu2 %v3643_v16  ;;  %v4019_v16 = vld [vmem:[%s5725_s17 + $0x5c] sm:$0xf0] }
 0x3e8   : > { %v4195_v54 = vpop.trf.xlu1 }
 0x3e9   : > { %v4199_v20 = vunpack.i.h.bf16 %v4195_v54  ;;  %v4196_v50 = vunpack.i.l.bf16 %v4195_v54  ;;  %v3404_v54 = vld [vmem:[%s4879_s2] sm:$0xf] }
 0x3eb   : > { %v4867_v28 = vpack.c.bf16 %v4196_v50, %v4191_v19  ;;  %v4869_v21 = vpack.c.bf16 %v4199_v20, %v4194_v18  ;;  %v4055_v18 = vld [vmem:[%s5725_s17 + $0x184] sm:$0xf]  ;;  %v3939_v50 = vld [vmem:[%s4879_s2 + $0x4] sm:$0xf0] }
 0x3ec   : > { %v3608_v19 = vld [vmem:[%s5725_s17 + $0x1a0] sm:$0xf0] }
 0x3ed   : > { %v3611_v20 = vor.u32 %v4055_v18, %v3608_v19 }
 0x3ef   : > { %2793 = vmatpush.bf16.msrb.mxu2 %v3611_v20  ;;  %v3870_v20 = vld [vmem:[%s5725_s17 + $0x388] sm:$0xf] }
 0x3f0   : > { %v4200_v44 = vpop.trf.xlu1 }
 0x3f1   : > { %v4204_v23 = vunpack.i.h.bf16 %v4200_v44  ;;  %v4201_v24 = vunpack.i.l.bf16 %v4200_v44  ;;  %v3638_v44 = vld [vmem:[%s5725_s17 + $0x1c0] sm:$0xf] }
 0x3f8   : > { %v4205_v25 = vpop.trf.xlu1 }
 0x3f9   : > { %v4209_v26 = vunpack.i.h.bf16 %v4205_v25  ;;  %v4206_v52 = vunpack.i.l.bf16 %v4205_v25  ;;  %v3576_v25 = vld [vmem:[%s5725_s17 + $0x160] sm:$0xf0] }
 0x3fb   : > { %v4871_v29 = vpack.c.bf16 %v4206_v52, %v4201_v24  ;;  %v4873_v30 = vpack.c.bf16 %v4209_v26, %v4204_v23  ;;  %v4067_v23 = vld [vmem:[%s5725_s17 + $0x1dc] sm:$0xf0]  ;;  %v4047_v24 = vld [vmem:[%s5725_s17 + $0x144] sm:$0xf]  ;;  %v3405_v26 = vor.u32 %v3939_v50, %v3404_v54  ;;  %v4124_v50 = vld [vmem:[%s5725_s17 + $0x3a4] sm:$0xf0] }
 0x3fc   : > { %v3894_v52 = vld [vmem:[%s5725_s17 + $0x3c0] sm:$0xf] }
 0x400   : > { %v4210_v48 = vpop.trf.xlu1 }
 0x401   : > { %v4214_v31 = vunpack.i.h.bf16 %v4210_v48  ;;  %v4211_v32 = vunpack.i.l.bf16 %v4210_v48  ;;  %v3606_v48 = vld [vmem:[%s5725_s17 + $0x180] sm:$0xf] }
 0x408   : > { %v4215_v33 = vpop.trf.xlu1 }
 0x409   : > { %v4219_v53 = vunpack.i.h.bf16 %v4215_v33  ;;  %v4216_v34 = vunpack.i.l.bf16 %v4215_v33  ;;  %v1922_v33 = vld [vmem:[%s5723_s15] sm:$0xf] }
 0x40b   : > { %v1911_v37 = vpack.c.bf16 %v4216_v34, %v4211_v32  ;;  %v1912_v40 = vpack.c.bf16 %v4219_v53, %v4214_v31  ;;  %v4039_v31 = vld [vmem:[%s5725_s17 + $0x104] sm:$0xf]  ;;  %v3862_v34 = vld [vmem:[%s5725_s17 + $0x380] sm:$0xf] }
 0x40c   : > { %v3544_v32 = vld [vmem:[%s5725_s17 + $0x120] sm:$0xf0] }
 0x410   : > { %v4220_v51 = vpop.trf.xlu1 }
 0x411   : > { %v4224_v22 = vunpack.i.h.bf16 %v4220_v51  ;;  %v4221_v12 = vunpack.i.l.bf16 %v4220_v51  ;;  %v3547_v51 = vor.u32 %v4039_v31, %v3544_v32  ;;  %v3646_v31 = vld [vmem:[%s5725_s17 + $0x1c8] sm:$0xf] }
 0x412   : > { %v4068_v32 = vld [vmem:[%s5725_s17 + $0x1e4] sm:$0xf0] }
 0x418   : > { %v4225_v46 = vpop.trf.xlu1 }
 0x419   : > { %v4229_v47 = vunpack.i.h.bf16 %v4225_v46  ;;  %v4226_v9 = vunpack.i.l.bf16 %v4225_v46  ;;  %v4031_v46 = vld [vmem:[%s5725_s17 + $0xc4] sm:$0xf] }
 0x41b   : > { %v1913_v13 = vpack.c.bf16 %v4226_v9, %v4221_v12  ;;  %v1914_v14 = vpack.c.bf16 %v4229_v47, %v4224_v22  ;;  %v4007_v9 = vld [vmem:[%s5725_s17 + $0x4] sm:$0xf]  ;;  %v3902_v22 = vld [vmem:[%s5725_s17 + $0x3c8] sm:$0xf] }
 0x41c   : > { %v4132_v12 = vld [vmem:[%s5725_s17 + $0x3e4] sm:$0xf0] }
 0x41d   : > { %v3903_v19 = vor.u32 %v4132_v12, %v3902_v22  ;;  %v3768_v22 = vld [vmem:[%s5725_s17 + $0x2e0] sm:$0xf0]  ;;  %v3774_v12 = vld [vmem:[%s5725_s17 + $0x2c8] sm:$0xf] }
 0x420   : > { %v4230_v55 = vpop.trf.xlu1 }
 0x421   : > { %v4234_v17 = vunpack.i.h.bf16 %v4230_v55  ;;  %v4231_v8 = vunpack.i.l.bf16 %v4230_v55  ;;  %v3512_v55 = vld [vmem:[%s5725_s17 + $0xe0] sm:$0xf0] }
 0x428   : > { %v4235_v56 = vpop.trf.xlu1 }
 0x429   : > { %v4239_v4 = vunpack.i.h.bf16 %v4235_v56  ;;  %v4236_v38 = vunpack.i.l.bf16 %v4235_v56 }
 0x42b   : > { %v1915_v39 = vpack.c.bf16 %v4236_v38, %v4231_v8  ;;  %v1916_v10 = vpack.c.bf16 %v4239_v4, %v4234_v17  ;;  %v3766_v38 = vld [vmem:[%s5725_s17 + $0x2c0] sm:$0xf] }
 0x42c   : > { %v3478_v17 = vld [vmem:[%s5725_s17 + $0x80] sm:$0xf] }
 0x42d   : > { %v4027_v8 = vld [vmem:[%s5725_s17 + $0x9c] sm:$0xf0] }
 0x42e   : > { %v3479_v49 = vor.u32 %v4027_v8, %v3478_v17  ;;  %v3454_v8 = vld [vmem:[%s5725_s17 + $0x48] sm:$0xf] }
 0x430   : > { %v4240_v57 = vpop.trf.xlu1 }
 0x431   : > { %v4244_v45 = vunpack.i.h.bf16 %v4240_v57  ;;  %v4241_v11 = vunpack.i.l.bf16 %v4240_v57  ;;  %v3830_v57 = vld [vmem:[%s5725_s17 + $0x340] sm:$0xf] }
 0x438   : > { %v4245_v42 = vpop.trf.xlu1 }
 0x439   : > { %v4249_v36 = vunpack.i.h.bf16 %v4245_v42  ;;  %v4246_v6 = vunpack.i.l.bf16 %v4245_v42  ;;  %v4115_v42 = vld [vmem:[%s5725_s17 + $0x35c] sm:$0xf0] }
 0x43a   : > { %v3831_v62 = vor.u32 %v4115_v42, %v3830_v57  ;;  %v3550_v42 = vld [vmem:[%s5725_s17 + $0x108] sm:$0xf] }
 0x43b   : > { %v1917_v5 = vpack.c.bf16 %v4246_v6, %v4241_v11  ;;  %v1918_v7 = vpack.c.bf16 %v4249_v36, %v4244_v45  ;;  %v3543_v36 = vor.u32 %v4043_v60, %v3542_v58  ;;  %v3510_v6 = vld [vmem:[%s5725_s17 + $0xc0] sm:$0xf]  ;;  %v4015_v45 = vld [vmem:[%s5725_s17 + $0x44] sm:$0xf]  ;;  %v3518_v60 = vld [vmem:[%s5725_s17 + $0xc8] sm:$0xf] }
 0x43c   : > { %v3448_v11 = vld [vmem:[%s5725_s17 + $0x60] sm:$0xf0] }
 0x43d   : > { %v3451_v47 = vor.u32 %v4015_v45, %v3448_v11  ;;  %v4103_v11 = vld [vmem:[%s5725_s17 + $0x304] sm:$0xf] }
 0x440   : > { %v4250_v59 = vpop.trf.xlu1 }
 0x441   : > { %v4254_v35 = vunpack.i.h.bf16 %v4250_v59  ;;  %v4251_v61 = vunpack.i.l.bf16 %v4250_v59 }
 0x448   : > { %v4255_v0 = vpop.trf.xlu1 }
 0x449   : > { %v4259_v43 = vunpack.i.h.bf16 %v4255_v0  ;;  %v4256_v63 = vunpack.i.l.bf16 %v4255_v0  ;;  %v3480_v0 = vld [vmem:[%s5725_s17 + $0xa0] sm:$0xf0] }
 0x44b   : > { %v1919_v1 = vpack.c.bf16 %v4256_v63, %v4251_v61  ;;  %v1920_v2 = vpack.c.bf16 %v4259_v43, %v4254_v35  ;;  %v3515_v35 = vor.u32 %v4031_v46, %v3512_v55  ;;  %v4023_v61 = vld [vmem:[%s5725_s17 + $0x84] sm:$0xf]  ;;  %v3798_v43 = vld [vmem:[%s5725_s17 + $0x300] sm:$0xf]  ;;  %v3582_v55 = vld [vmem:[%s5725_s17 + $0x148] sm:$0xf] }
 0x44c   : > { %v4107_v63 = vld [vmem:[%s5725_s17 + $0x31c] sm:$0xf0] }
 0x44d   : > { %1923 = vmatpush.bf16.msra.mxu1 %v1919_v1  ;;  %1936 = vmatpush.bf16.msra.mxu3 %v1920_v2  ;;  %v4035_v1 = vld [vmem:[%s5725_s17 + $0xdc] sm:$0xf0]  ;;  %v3483_v2 = vor.u32 %v4023_v61, %v3480_v0  ;;  %v3799_v4 = vor.u32 %v4107_v63, %v3798_v43  ;;  %v4111_v0 = vld [vmem:[%s5725_s17 + $0x344] sm:$0xf]  ;;  %v3838_v43 = vld [vmem:[%s5725_s17 + $0x348] sm:$0xf] }
 0x451   : > { %1924 = vmatpush.bf16.msra.mxu1 %v1917_v5  ;;  %1937 = vmatpush.bf16.msra.mxu3 %v1918_v7  ;;  %v4099_v5 = vld [vmem:[%s5725_s17 + $0x2dc] sm:$0xf0]  ;;  %v3511_v7 = vor.u32 %v4035_v1, %v3510_v6  ;;  %v3486_v6 = vld [vmem:[%s5725_s17 + $0x88] sm:$0xf] }
 0x452   : > { %v4028_v1 = vld [vmem:[%s5725_s17 + $0xa4] sm:$0xf0] }
 0x453   : > { %v3487_v45 = vor.u32 %v4028_v1, %v3486_v6 }
 0x455   : > { %1925 = vmatpush.bf16.msra.mxu1 %v1915_v39  ;;  %1938 = vmatpush.bf16.msra.mxu3 %v1916_v10  ;;  %v3416_v39 = vld [vmem:[%s5725_s17 + $0x20] sm:$0xf0]  ;;  %v3767_v10 = vor.u32 %v4099_v5, %v3766_v38  ;;  %v3806_v38 = vld [vmem:[%s5725_s17 + $0x308] sm:$0xf] }
 0x456   : > { %v3419_v18 = vor.u32 %v4007_v9, %v3416_v39  ;;  %v1984_v39 = vpop.f32.mrf.mxu2 }
 0x459   : > { %1926 = vmatpush.bf16.msra.mxu1 %v1913_v13  ;;  %1939 = vmatpush.bf16.msra.mxu3 %v1914_v14  ;;  %v3734_v13 = vld [vmem:[%s5725_s17 + $0x280] sm:$0xf] }
 0x45a   : > { %v4091_v14 = vld [vmem:[%s5725_s17 + $0x29c] sm:$0xf0] }
 0x45b   : > { %v3735_v54 = vor.u32 %v4091_v14, %v3734_v13  ;;  %v4100_v14 = vld [vmem:[%s5725_s17 + $0x2e4] sm:$0xf0] }
 0x45d   : > { %1927 = vmatpush.bf16.msra.mxu1 %v1911_v37  ;;  %1940 = vmatpush.bf16.msra.mxu3 %v1912_v40  ;;  %v4123_v37 = vld [vmem:[%s5725_s17 + $0x39c] sm:$0xf0] }
 0x45e   : > { %v3863_v56 = vor.u32 %v4123_v37, %v3862_v34  ;;  %v3864_v34 = vld [vmem:[%s5725_s17 + $0x3a0] sm:$0xf0] }
 0x461   : > { %1928 = vmatpush.bf16.msra.mxu1 %v4871_v29  ;;  %1941 = vmatpush.bf16.msra.mxu3 %v4873_v30  ;;  %v4131_v29 = vld [vmem:[%s5725_s17 + $0x3dc] sm:$0xf0]  ;;  %v3639_v30 = vor.u32 %v4067_v23, %v3638_v44 }
 0x462   : > { %v3895_v53 = vor.u32 %v4131_v29, %v3894_v52  ;;  %v3702_v44 = vld [vmem:[%s5725_s17 + $0x240] sm:$0xf]  ;;  %v3896_v52 = vld [vmem:[%s5725_s17 + $0x3e0] sm:$0xf0]  ;;  %v3871_v29 = vor.u32 %v4124_v50, %v3870_v20  ;;  %v3742_v20 = vld [vmem:[%s5725_s17 + $0x288] sm:$0xf] }
 0x463   : > { %v4083_v23 = vld [vmem:[%s5725_s17 + $0x25c] sm:$0xf0] }
 0x465   : > { %1929 = vmatpush.bf16.msra.mxu1 %v4867_v28  ;;  %1942 = vmatpush.bf16.msra.mxu3 %v4869_v21  ;;  %v4059_v28 = vld [vmem:[%s5725_s17 + $0x19c] sm:$0xf0]  ;;  %v3579_v21 = vor.u32 %v4047_v24, %v3576_v25 }
 0x466   : > { %v3607_v40 = vor.u32 %v4059_v28, %v3606_v48  ;;  %v3414_v24 = vld [vmem:[%s5725_s17] sm:$0xf] }
 0x467   : > { %2794 = vmatpush.bf16.msrb.mxu2 %v3579_v21  ;;  %v4011_v25 = vld [vmem:[%s5725_s17 + $0x1c] sm:$0xf0] }
 0x468   : > { %v3670_v48 = vld [vmem:[%s5725_s17 + $0x200] sm:$0xf]  ;;  %v3415_v21 = vor.u32 %v4011_v25, %v3414_v24  ;;  %v3704_v24 = vld [vmem:[%s5725_s17 + $0x260] sm:$0xf0]  ;;  %v3710_v25 = vld [vmem:[%s5725_s17 + $0x248] sm:$0xf] }
 0x469   : > { %1930 = vmatpush.bf16.msra.mxu1 %v4863_v41  ;;  %1943 = vmatpush.bf16.msra.mxu3 %v4865_v27  ;;  %v3574_v41 = vld [vmem:[%s5725_s17 + $0x140] sm:$0xf] }
 0x46a   : > { %v4051_v27 = vld [vmem:[%s5725_s17 + $0x15c] sm:$0xf0] }
 0x46b   : > { %v3575_v59 = vor.u32 %v4051_v27, %v3574_v41  ;;  %2795 = vmatpush.bf16.msrb.mxu2 %v3547_v51  ;;  %v4075_v28 = vld [vmem:[%s5725_s17 + $0x21c] sm:$0xf0]  ;;  %v3614_v41 = vld [vmem:[%s5725_s17 + $0x188] sm:$0xf] }
 0x46c   : > { %1931 = vmatmul.bf16.vlgmr.msra.gmra.mxu1 %v1922_v33  ;;  %1944 = vmatmul.bf16.vlgmr.msra.gmra.mxu3 %v1922_v33  ;;  %v3671_v37 = vor.u32 %v4075_v28, %v3670_v48  ;;  %v4060_v27 = vld [vmem:[%s5725_s17 + $0x1a4] sm:$0xf0]  ;;  %v4071_v48 = vld [vmem:[%s5725_s17 + $0x204] sm:$0xf] }
 0x46d   : > { %1969 = vmatpush.bf16.msrb.mxu1 %v3405_v26  ;;  %2766 = vmatpush.bf16.msrb.mxu3 %v3639_v30  ;;  %v4127_v26 = vld [vmem:[%s5725_s17 + $0x3c4] sm:$0xf]  ;;  %v3703_v30 = vor.u32 %v4083_v23, %v3702_v44  ;;  %v3615_v46 = vor.u32 %v4060_v27, %v3614_v41  ;;  %v4092_v44 = vld [vmem:[%s5725_s17 + $0x2a4] sm:$0xf0]  ;;  %v3904_v41 = vld [vmem:[%s5725_s17 + $0x3e8] sm:$0xf0]  ;;  %v1992_v27 = vpop.permute.xlu2 %1991 }
 0x46e   : > { %v3899_v33 = vor.u32 %v4127_v26, %v3896_v52  ;;  %v3743_v23 = vor.u32 %v4092_v44, %v3742_v20  ;;  %v1986_v26 = vpop.f32.mrf.mxu2  ;;  %v3672_v28 = vld [vmem:[%s5725_s17 + $0x220] sm:$0xf0]  ;;  %v3552_v44 = vld [vmem:[%s5725_s17 + $0x128] sm:$0xf0] }
 0x46f   : > { %2796 = vmatpush.bf16.msrb.mxu2 %v3515_v35  ;;  %v4036_v35 = vld [vmem:[%s5725_s17 + $0xe4] sm:$0xf0]  ;;  %v3712_v26 = vld [vmem:[%s5725_s17 + $0x268] sm:$0xf0] }
 0x470   : > { %v3519_v61 = vor.u32 %v4036_v35, %v3518_v60  ;;  %v4112_v60 = vld [vmem:[%s5725_s17 + $0x34c] sm:$0xf] }
 0x471   : > { %2779 = vmatpush.bf16.msra.mxu1 %v3895_v53  ;;  %2767 = vmatpush.bf16.msrb.mxu3 %v3607_v40  ;;  %v4119_v53 = vld [vmem:[%s5725_s17 + $0x384] sm:$0xf]  ;;  %v3647_v40 = vor.u32 %v4068_v32, %v3646_v31  ;;  %v3675_v31 = vor.u32 %v4071_v48, %v3672_v28  ;;  %v4076_v32 = vld [vmem:[%s5725_s17 + $0x224] sm:$0xf0]  ;;  %v3840_v35 = vld [vmem:[%s5725_s17 + $0x368] sm:$0xf0] }
 0x472   : > { %v3867_v51 = vor.u32 %v4119_v53, %v3864_v34  ;;  %v3843_v6 = vor.u32 %v4112_v60, %v3840_v35  ;;  %v3520_v48 = vld [vmem:[%s5725_s17 + $0xe8] sm:$0xf0]  ;;  %v3526_v28 = vld [vmem:[%s5725_s17 + $0xd0] sm:$0xf]  ;;  %v3624_v60 = vld [vmem:[%s5725_s17 + $0x1b0] sm:$0xf0] }
 0x473   : > { %2797 = vmatpush.bf16.msrb.mxu2 %v3483_v2  ;;  %v4016_v35 = vld [vmem:[%s5725_s17 + $0x4c] sm:$0xf] }
 0x475   : > { %2780 = vmatpush.bf16.msra.mxu1 %v3863_v56  ;;  %2768 = vmatpush.bf16.msrb.mxu3 %v3575_v59  ;;  %v4052_v56 = vld [vmem:[%s5725_s17 + $0x164] sm:$0xf0] }
 0x476   : > { %v3583_v57 = vor.u32 %v4052_v56, %v3582_v55  ;;  %v4044_v59 = vld [vmem:[%s5725_s17 + $0x124] sm:$0xf0] }
 0x477   : > { %2798 = vmatpush.bf16.msrb.mxu2 %v3451_v47  ;;  %v3551_v58 = vor.u32 %v4044_v59, %v3550_v42  ;;  %v4020_v47 = vld [vmem:[%s5725_s17 + $0x64] sm:$0xf0]  ;;  %v3872_v42 = vld [vmem:[%s5725_s17 + $0x3a8] sm:$0xf0] }
 0x478   : > { %v3455_v9 = vor.u32 %v4020_v47, %v3454_v8  ;;  %v4061_v8 = vld [vmem:[%s5725_s17 + $0x1ac] sm:$0xf0] }
 0x479   : > { %2781 = vmatpush.bf16.msra.mxu1 %v3831_v62  ;;  %2769 = vmatpush.bf16.msrb.mxu3 %v3543_v36  ;;  %v3832_v62 = vld [vmem:[%s5725_s17 + $0x360] sm:$0xf0]  ;;  %v4116_v36 = vld [vmem:[%s5725_s17 + $0x364] sm:$0xf0] }
 0x47a   : > { %v3835_v63 = vor.u32 %v4111_v0, %v3832_v62  ;;  %v3839_v2 = vor.u32 %v4116_v36, %v3838_v43  ;;  %v4064_v0 = vld [vmem:[%s5725_s17 + $0x1cc] sm:$0xf]  ;;  %v4069_v36 = vld [vmem:[%s5725_s17 + $0x1ec] sm:$0xf0] }
 0x47b   : > { %2799 = vmatpush.bf16.msrb.mxu2 %v3419_v18  ;;  %v3648_v43 = vld [vmem:[%s5725_s17 + $0x1e8] sm:$0xf0] }
 0x47c   : > { %3410 = vmatmul.msk.bf16.vlgmr.msrb.gmra.mxu1 %vm1115_vm1, %v4886_v3  ;;  %v3447_v3 = vor.u32 %v4019_v16, %v3446_v15  ;;  %v3422_v15 = vld [vmem:[%s5725_s17 + $0x8] sm:$0xf] }
 0x47d   : > { %2782 = vmatpush.bf16.msra.mxu1 %v3799_v4  ;;  %2770 = vmatpush.bf16.msrb.mxu3 %v3511_v7  ;;  %v3800_v4 = vld [vmem:[%s5725_s17 + $0x320] sm:$0xf0]  ;;  %v4108_v7 = vld [vmem:[%s5725_s17 + $0x324] sm:$0xf0] }
 0x47e   : > { %v3803_v5 = vor.u32 %v4103_v11, %v3800_v4  ;;  %v3807_v17 = vor.u32 %v4108_v7, %v3806_v38  ;;  %v4012_v16 = vld [vmem:[%s5725_s17 + $0x24] sm:$0xf0]  ;;  %v3651_v11 = vor.u32 %v4064_v0, %v3648_v43  ;;  %v4056_v38 = vld [vmem:[%s5725_s17 + $0x18c] sm:$0xf]  ;;  %v3462_v0 = vld [vmem:[%s5725_s17 + $0x50] sm:$0xf] }
 0x47f   : > { %2831 = vmatpush.bf16.msra.mxu2 %v3903_v19  ;;  %v3423_v18 = vor.u32 %v4012_v16, %v3422_v15  ;;  %v4087_v19 = vld [vmem:[%s5725_s17 + $0x284] sm:$0xf]  ;;  %v3616_v7 = vld [vmem:[%s5725_s17 + $0x1a8] sm:$0xf0]  ;;  %v4053_v15 = vld [vmem:[%s5725_s17 + $0x16c] sm:$0xf0] }
 0x481   : > { %2783 = vmatpush.bf16.msra.mxu1 %v3767_v10  ;;  %2771 = vmatpush.bf16.msrb.mxu3 %v3479_v49  ;;  %v4095_v10 = vld [vmem:[%s5725_s17 + $0x2c4] sm:$0xf]  ;;  %v3775_v49 = vor.u32 %v4100_v14, %v3774_v12  ;;  %v3584_v14 = vld [vmem:[%s5725_s17 + $0x168] sm:$0xf0] }
 0x482   : > { %v3771_v13 = vor.u32 %v4095_v10, %v3768_v22  ;;  %v3619_v22 = vor.u32 %v4056_v38, %v3616_v7  ;;  %v3910_v38 = vld [vmem:[%s5725_s17 + $0x3d0] sm:$0xf] }
 0x483   : > { %2832 = vmatpush.bf16.msra.mxu2 %v3871_v29  ;;  %v4084_v29 = vld [vmem:[%s5725_s17 + $0x264] sm:$0xf0]  ;;  %v4133_v7 = vld [vmem:[%s5725_s17 + $0x3ec] sm:$0xf0] }
 0x485   : > { %2784 = vmatpush.bf16.msra.mxu1 %v3735_v54  ;;  %2772 = vmatpush.bf16.msrb.mxu3 %v3447_v3  ;;  %v3736_v54 = vld [vmem:[%s5725_s17 + $0x2a0] sm:$0xf0] }
 0x486   : > { %v3739_v50 = vor.u32 %v4087_v19, %v3736_v54  ;;  %v4079_v3 = vld [vmem:[%s5725_s17 + $0x244] sm:$0xf]  ;;  %v3744_v19 = vld [vmem:[%s5725_s17 + $0x2a8] sm:$0xf0] }
 0x487   : > { %2833 = vmatpush.bf16.msra.mxu2 %v3839_v2  ;;  %v3707_v52 = vor.u32 %v4079_v3, %v3704_v24  ;;  %v4104_v2 = vld [vmem:[%s5725_s17 + $0x30c] sm:$0xf]  ;;  %v4045_v3 = vld [vmem:[%s5725_s17 + $0x12c] sm:$0xf0] }
 0x489   : > { %2785 = vmatpush.bf16.msra.mxu1 %v3703_v30  ;;  %2773 = vmatpush.bf16.msrb.mxu3 %v3415_v21  ;;  %v3711_v30 = vor.u32 %v4084_v29, %v3710_v25  ;;  %v3678_v21 = vld [vmem:[%s5725_s17 + $0x208] sm:$0xf]  ;;  %v4080_v25 = vld [vmem:[%s5725_s17 + $0x24c] sm:$0xf] }
 0x48b   : > { %2834 = vmatpush.bf16.msra.mxu2 %v3807_v17  ;;  %v3622_v17 = vld [vmem:[%s5725_s17 + $0x190] sm:$0xf] }
 0x48c   : > { %v3623_v12 = vor.u32 %v4061_v8, %v3622_v17  ;;  %v4129_v17 = vld [vmem:[%s5725_s17 + $0x3d4] sm:$0xf] }
 0x48d   : > { %2805 = vmatpush.bf16.msra.mxu3 %v3899_v33  ;;  %2786 = vmatpush.bf16.msra.mxu1 %v3671_v37  ;;  %v3679_v33 = vor.u32 %v4076_v32, %v3678_v21  ;;  %v4037_v21 = vld [vmem:[%s5725_s17 + $0xec] sm:$0xf0]  ;;  %v4072_v32 = vld [vmem:[%s5725_s17 + $0x20c] sm:$0xf]  ;;  %v3912_v8 = vld [vmem:[%s5725_s17 + $0x3f0] sm:$0xf0] }
 0x48f   : > { %2835 = vmatpush.bf16.msra.mxu2 %v3775_v49  ;;  %v3590_v49 = vld [vmem:[%s5725_s17 + $0x150] sm:$0xf] }
 0x490   : > { %v3591_v20 = vor.u32 %v4053_v15, %v3590_v49  ;;  %v4125_v49 = vld [vmem:[%s5725_s17 + $0x3ac] sm:$0xf0]  ;;  %v4121_v15 = vld [vmem:[%s5725_s17 + $0x394] sm:$0xf] }
 0x491   : > { %2818 = vmatpush.bf16.msrb.mxu1 %v3647_v40  ;;  %2806 = vmatpush.bf16.msra.mxu3 %v3867_v51  ;;  %v4128_v40 = vld [vmem:[%s5725_s17 + $0x3cc] sm:$0xf] }
 0x492   : > { %v3907_v55 = vor.u32 %v4128_v40, %v3904_v41  ;;  %v3656_v40 = vld [vmem:[%s5725_s17 + $0x1f0] sm:$0xf0]  ;;  %v4024_v41 = vld [vmem:[%s5725_s17 + $0x8c] sm:$0xf] }
 0x493   : > { %2836 = vmatpush.bf16.msra.mxu2 %v3743_v23  ;;  %v3558_v23 = vld [vmem:[%s5725_s17 + $0x110] sm:$0xf] }
 0x494   : > { %v3559_v29 = vor.u32 %v4045_v3, %v3558_v23  ;;  %v4117_v23 = vld [vmem:[%s5725_s17 + $0x36c] sm:$0xf0]  ;;  %v4113_v3 = vld [vmem:[%s5725_s17 + $0x354] sm:$0xf] }
 0x495   : > { %2819 = vmatpush.bf16.msrb.mxu1 %v3615_v46  ;;  %2807 = vmatpush.bf16.msra.mxu3 %v3835_v63  ;;  %v3654_v63 = vld [vmem:[%s5725_s17 + $0x1d0] sm:$0xf] }
 0x496   : > { %v3655_v4 = vor.u32 %v4069_v36, %v3654_v63  ;;  %v4049_v63 = vld [vmem:[%s5725_s17 + $0x154] sm:$0xf] }
 0x497   : > { %2837 = vmatpush.bf16.msra.mxu2 %v3711_v30  ;;  %v4032_v30 = vld [vmem:[%s5725_s17 + $0xcc] sm:$0xf] }
 0x499   : > { %2820 = vmatpush.bf16.msrb.mxu1 %v3583_v57  ;;  %2808 = vmatpush.bf16.msra.mxu3 %v3803_v5  ;;  %v4120_v57 = vld [vmem:[%s5725_s17 + $0x38c] sm:$0xf] }
 0x49a   : > { %v3875_v59 = vor.u32 %v4120_v57, %v3872_v42 }
 0x49b   : > { %2838 = vmatpush.bf16.msra.mxu2 %v3679_v33  ;;  %v3680_v33 = vld [vmem:[%s5725_s17 + $0x228] sm:$0xf0] }
 0x49d   : > { %2821 = vmatpush.bf16.msrb.mxu1 %v3551_v58  ;;  %2809 = vmatpush.bf16.msra.mxu3 %v3771_v13  ;;  %v4048_v13 = vld [vmem:[%s5725_s17 + $0x14c] sm:$0xf] }
 0x49e   : > { %v3587_v54 = vor.u32 %v4048_v13, %v3584_v14  ;;  %v3915_v13 = vor.u32 %v4129_v17, %v3912_v8  ;;  %v3878_v14 = vld [vmem:[%s5725_s17 + $0x390] sm:$0xf]  ;;  %v3854_v17 = vld [vmem:[%s5725_s17 + $0x358] sm:$0xf] }
 0x4a1   : > { %2822 = vmatpush.bf16.msrb.mxu1 %v3519_v61  ;;  %2810 = vmatpush.bf16.msra.mxu3 %v3739_v50  ;;  %v4040_v50 = vld [vmem:[%s5725_s17 + $0x10c] sm:$0xf] }
 0x4a5   : > { %2823 = vmatpush.bf16.msrb.mxu1 %v3487_v45  ;;  %2811 = vmatpush.bf16.msra.mxu3 %v3707_v52  ;;  %v3808_v45 = vld [vmem:[%s5725_s17 + $0x328] sm:$0xf0]  ;;  %v3555_v52 = vor.u32 %v4040_v50, %v3552_v44  ;;  %v3846_v44 = vld [vmem:[%s5725_s17 + $0x350] sm:$0xf] }
 0x4a6   : > { %v3811_v47 = vor.u32 %v4104_v2, %v3808_v45  ;;  %v4008_v2 = vld [vmem:[%s5725_s17 + $0xc] sm:$0xf] }
 0x4a7   : > { %v3424_v45 = vld [vmem:[%s5725_s17 + $0x28] sm:$0xf0] }
 0x4a9   : > { %2824 = vmatpush.bf16.msrb.mxu1 %v3455_v9  ;;  %2812 = vmatpush.bf16.msra.mxu3 %v3675_v31  ;;  %v4096_v9 = vld [vmem:[%s5725_s17 + $0x2cc] sm:$0xf]  ;;  %v3715_v31 = vor.u32 %v4080_v25, %v3712_v26  ;;  %v4025_v26 = vld [vmem:[%s5725_s17 + $0x94] sm:$0xf] }
 0x4ad   : > { %2825 = vmatpush.bf16.msrb.mxu1 %v3423_v18  ;;  %v4088_v18 = vld [vmem:[%s5725_s17 + $0x28c] sm:$0xf] }
 0x4ae   : > { %v3747_v24 = vor.u32 %v4088_v18, %v3744_v19  ;;  %v4033_v19 = vld [vmem:[%s5725_s17 + $0xd4] sm:$0xf] }
 0x4e9   : > { %v1932_v53 = vpop.f32.mrf.mxu1 }
 0x4ef   : > { %v1945_v34 = vpop.f32.mrf.mxu3 }
 0x4f0   : > { %v1985_v37 = vadd.f32 %v1984_v39, %v1945_v34  ;;  %v3776_v39 = vld [vmem:[%s5725_s17 + $0x2e8] sm:$0xf0]  ;;  %v3527_v34 = vor.u32 %v4037_v21, %v3526_v28  ;;  %v4109_v28 = vld [vmem:[%s5725_s17 + $0x32c] sm:$0xf0]  ;;  %v4105_v21 = vld [vmem:[%s5725_s17 + $0x314] sm:$0xf] }
 0x4f1   : > { %v1934_v51 = vpop.f32.mrf.mxu1  ;;  %v3779_v16 = vor.u32 %v4096_v9, %v3776_v39  ;;  %v3427_v9 = vor.u32 %v4008_v2, %v3424_v45  ;;  %v4126_v2 = vld [vmem:[%s5725_s17 + $0x3b4] sm:$0xf0]  ;;  %v3718_v45 = vld [vmem:[%s5725_s17 + $0x250] sm:$0xf] }
 0x4f2   : > { %v1995_v46 = vadd.f32 %v1992_v27, %v1985_v37  ;;  %v4065_v37 = vld [vmem:[%s5725_s17 + $0x1d4] sm:$0xf]  ;;  %v3494_v51 = vld [vmem:[%s5725_s17 + $0x90] sm:$0xf] }
 0x4f3   : > { %v3659_v57 = vor.u32 %v4065_v37, %v3656_v40  ;;  %v3782_v40 = vld [vmem:[%s5725_s17 + $0x2d0] sm:$0xf] }
 0x4f4   : > { %v5197_v56 = vpack.c.bf16 %v1995_v46, %v1995_v46  ;;  %v4029_v46 = vld [vmem:[%s5725_s17 + $0xac] sm:$0xf0] }
 0x4f6   : > { %2787 = vmatmul.bf16.vlgmr.msra.gmra.mxu1 %v5197_v56 }
 0x4f7   : > { %2857 = vmatpush.bf16.msra.mxu1 %v3907_v55  ;;  %v1947_v58 = vpop.f32.mrf.mxu3  ;;  %v3683_v55 = vor.u32 %v4072_v32, %v3680_v33  ;;  %v4017_v33 = vld [vmem:[%s5725_s17 + $0x54] sm:$0xf] }
 0x4f8   : > { %v4057_v58 = vld [vmem:[%s5725_s17 + $0x194] sm:$0xf] }
 0x4f9   : > { %v1971_v61 = vpop.f32.mrf.mxu1  ;;  %v3627_v43 = vor.u32 %v4057_v58, %v3624_v60  ;;  %v3918_v58 = vld [vmem:[%s5725_s17 + $0x3d8] sm:$0xf] }
 0x4fa   : > { %v1972_v62 = vadd.f32 %v1971_v61, %v1932_v53  ;;  %v3523_v53 = vor.u32 %v4032_v30, %v3520_v48  ;;  %v3456_v61 = vld [vmem:[%s5725_s17 + $0x68] sm:$0xf0]  ;;  %v3814_v48 = vld [vmem:[%s5725_s17 + $0x310] sm:$0xf]  ;;  %v4134_v60 = vld [vmem:[%s5725_s17 + $0x3f4] sm:$0xf0] }
 0x4fb   : > { %2858 = vmatpush.bf16.msra.mxu1 %v3875_v59  ;;  %v3495_v59 = vor.u32 %v4029_v46, %v3494_v51  ;;  %v3459_v36 = vor.u32 %v4016_v35, %v3456_v61  ;;  %v3784_v51 = vld [vmem:[%s5725_s17 + $0x2f0] sm:$0xf0]  ;;  %v3750_v35 = vld [vmem:[%s5725_s17 + $0x290] sm:$0xf] }
 0x4fc   : > { %v1994_v1 = vadd.f32 %v1992_v27, %v1972_v62  ;;  %v3488_v27 = vld [vmem:[%s5725_s17 + $0xa8] sm:$0xf0]  ;;  %v4021_v62 = vld [vmem:[%s5725_s17 + $0x6c] sm:$0xf0] }
 0x4fd   : > { %v3491_v42 = vor.u32 %v4024_v41, %v3488_v27  ;;  %v4101_v41 = vld [vmem:[%s5725_s17 + $0x2ec] sm:$0xf0]  ;;  %v4097_v27 = vld [vmem:[%s5725_s17 + $0x2d4] sm:$0xf] }
 0x4fe   : > { %v5233_v5 = vpack.c.bf16 %v1994_v1, %v1994_v1  ;;  %v3592_v1 = vld [vmem:[%s5725_s17 + $0x170] sm:$0xf0]  ;;  %v4093_v61 = vld [vmem:[%s5725_s17 + $0x2ac] sm:$0xf0] }
 0x4ff   : > { %2859 = vmatpush.bf16.msra.mxu1 %v3843_v6  ;;  %v3463_v6 = vor.u32 %v4021_v62, %v3462_v0  ;;  %v4089_v0 = vld [vmem:[%s5725_s17 + $0x294] sm:$0xf] }
 0x500   : > { %2774 = vmatmul.bf16.vlgmr.msrb.gmra.mxu3 %v5233_v5  ;;  %2800 = vmatmul.bf16.vlgmr.msrb.gmra.mxu2 %v5233_v5  ;;  %v3752_v62 = vld [vmem:[%s5725_s17 + $0x2b0] sm:$0xf0] }
 0x501   : > { %2844 = vmatpush.bf16.msrb.mxu3 %v3651_v11  ;;  %2870 = vmatpush.bf16.msrb.mxu2 %v3655_v4  ;;  %v1973_v10 = vpop.f32.mrf.mxu1  ;;  %v3430_v11 = vld [vmem:[%s5725_s17 + $0x10] sm:$0xf] }
 0x502   : > { %v4013_v4 = vld [vmem:[%s5725_s17 + $0x2c] sm:$0xf0]  ;;  %v4041_v10 = vld [vmem:[%s5725_s17 + $0x114] sm:$0xf] }
 0x503   : > { %2860 = vmatpush.bf16.msra.mxu1 %v3811_v47  ;;  %v3595_v47 = vor.u32 %v4049_v63, %v3592_v1  ;;  %v3431_v39 = vor.u32 %v4013_v4, %v3430_v11  ;;  %v3919_v63 = vor.u32 %v4134_v60, %v3918_v58  ;;  %v3886_v1 = vld [vmem:[%s5725_s17 + $0x398] sm:$0xf]  ;;  %v4085_v11 = vld [vmem:[%s5725_s17 + $0x26c] sm:$0xf0]  ;;  %v4081_v4 = vld [vmem:[%s5725_s17 + $0x254] sm:$0xf] }
 0x504   : > { %v3719_v8 = vor.u32 %v4085_v11, %v3718_v45  ;;  %v4086_v58 = vld [vmem:[%s5725_s17 + $0x274] sm:$0xf0]  ;;  %v4026_v45 = vld [vmem:[%s5725_s17 + $0x9c] sm:$0xf] }
 0x505   : > { %2845 = vmatpush.bf16.msrb.mxu3 %v3619_v22  ;;  %2871 = vmatpush.bf16.msrb.mxu2 %v3623_v12  ;;  %v3560_v22 = vld [vmem:[%s5725_s17 + $0x130] sm:$0xf0]  ;;  %v3911_v12 = vor.u32 %v4133_v7, %v3910_v38  ;;  %v3887_v7 = vor.u32 %v4126_v2, %v3886_v1  ;;  %v3534_v60 = vld [vmem:[%s5725_s17 + $0xd8] sm:$0xf]  ;;  %v3504_v11 = vld [vmem:[%s5725_s17 + $0xb8] sm:$0xf0] }
 0x506   : > { %2826 = vmatmul.bf16.vlgmr.msrb.gmra.mxu1 %v5233_v5  ;;  %v3563_v18 = vor.u32 %v4041_v10, %v3560_v22  ;;  %v3720_v38 = vld [vmem:[%s5725_s17 + $0x270] sm:$0xf0]  ;;  %v4077_v10 = vld [vmem:[%s5725_s17 + $0x22c] sm:$0xf0]  ;;  %v3502_v1 = vld [vmem:[%s5725_s17 + $0x98] sm:$0xf] }
 0x507   : > { %2861 = vmatpush.bf16.msra.mxu1 %v3779_v16  ;;  %v3880_v16 = vld [vmem:[%s5725_s17 + $0x3b0] sm:$0xf0]  ;;  %v4030_v2 = vld [vmem:[%s5725_s17 + $0xb4] sm:$0xf0] }
 0x508   : > { %v3883_v50 = vor.u32 %v4121_v15, %v3880_v16  ;;  %v4073_v22 = vld [vmem:[%s5725_s17 + $0x214] sm:$0xf]  ;;  %v3664_v15 = vld [vmem:[%s5725_s17 + $0x1f8] sm:$0xf0] }
 0x509   : > { %2846 = vmatpush.bf16.msrb.mxu3 %v3587_v54  ;;  %2872 = vmatpush.bf16.msrb.mxu2 %v3591_v20  ;;  %v3528_v54 = vld [vmem:[%s5725_s17 + $0xf0] sm:$0xf0]  ;;  %v3879_v20 = vor.u32 %v4125_v49, %v3878_v14  ;;  %v4070_v14 = vld [vmem:[%s5725_s17 + $0x1f4] sm:$0xf0]  ;;  %v4066_v49 = vld [vmem:[%s5725_s17 + $0x1dc] sm:$0xf] }
 0x50a   : > { %v3531_v25 = vor.u32 %v4033_v19, %v3528_v54 }
 0x50b   : > { %2862 = vmatpush.bf16.msra.mxu1 %v3747_v24  ;;  %v3848_v24 = vld [vmem:[%s5725_s17 + $0x370] sm:$0xf0] }
 0x50c   : > { %v3851_v30 = vor.u32 %v4113_v3, %v3848_v24  ;;  %v4062_v3 = vld [vmem:[%s5725_s17 + $0x1b4] sm:$0xf0]  ;;  %v4058_v24 = vld [vmem:[%s5725_s17 + $0x19c] sm:$0xf] }
 0x50d   : > { %2847 = vmatpush.bf16.msrb.mxu3 %v3555_v52  ;;  %2873 = vmatpush.bf16.msrb.mxu2 %v3559_v29  ;;  %v3496_v52 = vld [vmem:[%s5725_s17 + $0xb0] sm:$0xf0]  ;;  %v3847_v29 = vor.u32 %v4117_v23, %v3846_v44  ;;  %v4110_v44 = vld [vmem:[%s5725_s17 + $0x334] sm:$0xf0] }
 0x50e   : > { %v3499_v32 = vor.u32 %v4025_v26, %v3496_v52  ;;  %v3630_v23 = vld [vmem:[%s5725_s17 + $0x198] sm:$0xf] }
 0x50f   : > { %2863 = vmatpush.bf16.msra.mxu1 %v3715_v31  ;;  %v3816_v31 = vld [vmem:[%s5725_s17 + $0x330] sm:$0xf0]  ;;  %v3631_v52 = vor.u32 %v4062_v3, %v3630_v23  ;;  %v3856_v23 = vld [vmem:[%s5725_s17 + $0x378] sm:$0xf0] }
 0x510   : > { %2813 = vmatmul.bf16.vlgmr.msra.gmra.mxu3 %v5197_v56  ;;  %2839 = vmatmul.bf16.vlgmr.msra.gmra.mxu2 %v5197_v56  ;;  %v3819_v37 = vor.u32 %v4105_v21, %v3816_v31  ;;  %v4054_v21 = vld [vmem:[%s5725_s17 + $0x174] sm:$0xf0]  ;;  %v4050_v31 = vld [vmem:[%s5725_s17 + $0x15c] sm:$0xf] }
 0x511   : > { %2848 = vmatpush.bf16.msrb.mxu3 %v3523_v53  ;;  %2874 = vmatpush.bf16.msrb.mxu2 %v3527_v34  ;;  %v3464_v53 = vld [vmem:[%s5725_s17 + $0x70] sm:$0xf0]  ;;  %v3815_v34 = vor.u32 %v4109_v28, %v3814_v48  ;;  %v4102_v48 = vld [vmem:[%s5725_s17 + $0x2f4] sm:$0xf0] }
 0x512   : > { %v3467_v46 = vor.u32 %v4017_v33, %v3464_v53  ;;  %v3598_v28 = vld [vmem:[%s5725_s17 + $0x158] sm:$0xf] }
 0x513   : > { %2864 = vmatpush.bf16.msra.mxu1 %v3683_v55  ;;  %v4009_v55 = vld [vmem:[%s5725_s17 + $0x14] sm:$0xf]  ;;  %v3599_v53 = vor.u32 %v4054_v21, %v3598_v28  ;;  %v4082_v21 = vld [vmem:[%s5725_s17 + $0x25c] sm:$0xf] }
 0x515   : > { %2849 = vmatpush.bf16.msrb.mxu3 %v3491_v42  ;;  %2875 = vmatpush.bf16.msrb.mxu2 %v3495_v59  ;;  %v3783_v42 = vor.u32 %v4101_v41, %v3782_v40  ;;  %v3787_v59 = vor.u32 %v4097_v27, %v3784_v51  ;;  %v4094_v40 = vld [vmem:[%s5725_s17 + $0x2b4] sm:$0xf0]  ;;  %v4042_v51 = vld [vmem:[%s5725_s17 + $0x11c] sm:$0xf] }
 0x516   : > { %2865 = vmatmul.bf16.vlgmr.msra.gmra.mxu1 %v5197_v56  ;;  %v3566_v41 = vld [vmem:[%s5725_s17 + $0x118] sm:$0xf] }
 0x517   : > { %2896 = vmatpush.bf16.msrb.mxu1 %v3659_v57  ;;  %v3432_v57 = vld [vmem:[%s5725_s17 + $0x30] sm:$0xf0]  ;;  %v4046_v27 = vld [vmem:[%s5725_s17 + $0x134] sm:$0xf0] }
 0x519   : > { %2850 = vmatpush.bf16.msrb.mxu3 %v3459_v36  ;;  %2876 = vmatpush.bf16.msrb.mxu2 %v3463_v6  ;;  %v3751_v36 = vor.u32 %v4093_v61, %v3750_v35  ;;  %v3755_v6 = vor.u32 %v4089_v0, %v3752_v62  ;;  %v4038_v35 = vld [vmem:[%s5725_s17 + $0xf4] sm:$0xf0]  ;;  %v4034_v61 = vld [vmem:[%s5725_s17 + $0xdc] sm:$0xf] }
 0x51a   : > { %v3536_v0 = vld [vmem:[%s5725_s17 + $0xf8] sm:$0xf0] }
 0x51b   : > { %2897 = vmatpush.bf16.msrb.mxu1 %v3627_v43  ;;  %v3435_v43 = vor.u32 %v4009_v55, %v3432_v57  ;;  %v3567_v57 = vor.u32 %v4046_v27, %v3566_v41 }
 0x51d   : > { %2851 = vmatpush.bf16.msrb.mxu3 %v3427_v9  ;;  %2877 = vmatpush.bf16.msrb.mxu2 %v3431_v39  ;;  %v4118_v9 = vld [vmem:[%s5725_s17 + $0x374] sm:$0xf0]  ;;  %v3686_v39 = vld [vmem:[%s5725_s17 + $0x210] sm:$0xf] }
 0x51e   : > { %v3855_v16 = vor.u32 %v4118_v9, %v3854_v17  ;;  %v3470_v17 = vld [vmem:[%s5725_s17 + $0x58] sm:$0xf]  ;;  %v3472_v9 = vld [vmem:[%s5725_s17 + $0x78] sm:$0xf0] }
 0x51f   : > { %2898 = vmatpush.bf16.msrb.mxu1 %v3595_v47  ;;  %v3723_v47 = vor.u32 %v4081_v4, %v3720_v38  ;;  %v3503_v38 = vor.u32 %v4030_v2, %v3502_v1 }
 0x520   : > { %2852 = vmatmul.bf16.vlgmr.msrb.gmra.mxu3 %v5233_v5  ;;  %2878 = vmatmul.bf16.vlgmr.msrb.gmra.mxu2 %v5233_v5 }
 0x521   : > { %2883 = vmatpush.bf16.msra.mxu3 %v3911_v12  ;;  %2909 = vmatpush.bf16.msra.mxu2 %v3915_v13  ;;  %v3688_v12 = vld [vmem:[%s5725_s17 + $0x230] sm:$0xf0]  ;;  %v3662_v13 = vld [vmem:[%s5725_s17 + $0x1d8] sm:$0xf] }
 0x522   : > { %v3691_v19 = vor.u32 %v4073_v22, %v3688_v12  ;;  %v3663_v54 = vor.u32 %v4070_v14, %v3662_v13  ;;  %v3438_v22 = vld [vmem:[%s5725_s17 + $0x18] sm:$0xf]  ;;  %v4010_v13 = vld [vmem:[%s5725_s17 + $0x1c] sm:$0xf] }
 0x523   : > { %2899 = vmatpush.bf16.msrb.mxu1 %v3563_v18  ;;  %v3687_v18 = vor.u32 %v4077_v10, %v3686_v39  ;;  %v4014_v12 = vld [vmem:[%s5725_s17 + $0x34] sm:$0xf0]  ;;  %v3440_v14 = vld [vmem:[%s5725_s17 + $0x38] sm:$0xf0] }
 0x525   : > { %2884 = vmatpush.bf16.msra.mxu3 %v3879_v20  ;;  %2910 = vmatpush.bf16.msra.mxu2 %v3883_v50  ;;  %v3667_v20 = vor.u32 %v4066_v49, %v3664_v15  ;;  %v3822_v50 = vld [vmem:[%s5725_s17 + $0x318] sm:$0xf]  ;;  %v4130_v49 = vld [vmem:[%s5725_s17 + $0x3dc] sm:$0xf] }
 0x526   : > { %v3823_v26 = vor.u32 %v4110_v44, %v3822_v50  ;;  %v3920_v15 = vld [vmem:[%s5725_s17 + $0x3f8] sm:$0xf0] }
 0x527   : > { %2900 = vmatpush.bf16.msrb.mxu1 %v3531_v25  ;;  %v3632_v25 = vld [vmem:[%s5725_s17 + $0x1b8] sm:$0xf0] }
 0x528   : > { %v4114_v44 = vld [vmem:[%s5725_s17 + $0x35c] sm:$0xf] }
 0x529   : > { %2885 = vmatpush.bf16.msra.mxu3 %v3847_v29  ;;  %2911 = vmatpush.bf16.msra.mxu2 %v3851_v30  ;;  %v3635_v29 = vor.u32 %v4058_v24, %v3632_v25  ;;  %v3790_v30 = vld [vmem:[%s5725_s17 + $0x2d8] sm:$0xf]  ;;  %v3859_v3 = vor.u32 %v4114_v44, %v3856_v23  ;;  %v4106_v24 = vld [vmem:[%s5725_s17 + $0x31c] sm:$0xf] }
 0x52a   : > { %v3791_v33 = vor.u32 %v4102_v48, %v3790_v30  ;;  %v3824_v25 = vld [vmem:[%s5725_s17 + $0x338] sm:$0xf0] }
 0x52b   : > { %2901 = vmatpush.bf16.msrb.mxu1 %v3499_v32  ;;  %v3600_v32 = vld [vmem:[%s5725_s17 + $0x178] sm:$0xf0] }
 0x52c   : > { %v4090_v30 = vld [vmem:[%s5725_s17 + $0x29c] sm:$0xf] }
 0x52d   : > { %2886 = vmatpush.bf16.msra.mxu3 %v3815_v34  ;;  %2912 = vmatpush.bf16.msra.mxu2 %v3819_v37  ;;  %v3603_v34 = vor.u32 %v4050_v31, %v3600_v32  ;;  %v3758_v37 = vld [vmem:[%s5725_s17 + $0x298] sm:$0xf]  ;;  %v3760_v48 = vld [vmem:[%s5725_s17 + $0x2b8] sm:$0xf0] }
 0x52e   : > { %v3759_v55 = vor.u32 %v4094_v40, %v3758_v37  ;;  %v3763_v28 = vor.u32 %v4090_v30, %v3760_v48  ;;  %v3728_v31 = vld [vmem:[%s5725_s17 + $0x278] sm:$0xf0] }
 0x52f   : > { %2902 = vmatpush.bf16.msrb.mxu1 %v3467_v46  ;;  %v3568_v46 = vld [vmem:[%s5725_s17 + $0x138] sm:$0xf0]  ;;  %v3731_v32 = vor.u32 %v4082_v21, %v3728_v31 }
 0x531   : > { %2887 = vmatpush.bf16.msra.mxu3 %v3783_v42  ;;  %2913 = vmatpush.bf16.msra.mxu2 %v3787_v59  ;;  %v3571_v42 = vor.u32 %v4042_v51, %v3568_v46  ;;  %v3726_v59 = vld [vmem:[%s5725_s17 + $0x258] sm:$0xf] }
 0x532   : > { %v3727_v62 = vor.u32 %v4086_v58, %v3726_v59 }
 0x533   : > { %2903 = vmatpush.bf16.msrb.mxu1 %v3435_v43  ;;  %v3535_v43 = vor.u32 %v4038_v35, %v3534_v60 }
 0x535   : > { %2888 = vmatpush.bf16.msra.mxu3 %v3751_v36  ;;  %2914 = vmatpush.bf16.msra.mxu2 %v3755_v6  ;;  %v3694_v36 = vld [vmem:[%s5725_s17 + $0x218] sm:$0xf] }
 0x536   : > { %2904 = vmatmul.bf16.vlgmr.msrb.gmra.mxu1 %v5233_v5  ;;  %v4078_v6 = vld [vmem:[%s5725_s17 + $0x234] sm:$0xf0] }
 0x537   : > { %2935 = vmatpush.bf16.msra.mxu1 %v3919_v63  ;;  %v3539_v63 = vor.u32 %v4034_v61, %v3536_v0  ;;  %v3695_v4 = vor.u32 %v4078_v6, %v3694_v36 }
 0x539   : > { %2889 = vmatpush.bf16.msra.mxu3 %v3719_v8  ;;  %2915 = vmatpush.bf16.msra.mxu2 %v3723_v47  ;;  %v4022_v8 = vld [vmem:[%s5725_s17 + $0x74] sm:$0xf0]  ;;  %v4018_v47 = vld [vmem:[%s5725_s17 + $0x5c] sm:$0xf] }
 0x53a   : > { %v3471_v39 = vor.u32 %v4022_v8, %v3470_v17  ;;  %v3475_v10 = vor.u32 %v4018_v47, %v3472_v9 }
 0x53b   : > { %2936 = vmatpush.bf16.msra.mxu1 %v3887_v7  ;;  %v3507_v7 = vor.u32 %v4026_v45, %v3504_v11 }
 0x53d   : > { %2890 = vmatpush.bf16.msra.mxu3 %v3687_v18  ;;  %2916 = vmatpush.bf16.msra.mxu2 %v3691_v19  ;;  %v3443_v18 = vor.u32 %v4010_v13, %v3440_v14  ;;  %v3923_v19 = vor.u32 %v4130_v49, %v3920_v15 }
 0x53f   : > { %2937 = vmatpush.bf16.msra.mxu1 %v3855_v16  ;;  %v3439_v16 = vor.u32 %v4014_v12, %v3438_v22 }
 0x540   : > { %2891 = vmatmul.bf16.vlgmr.msra.gmra.mxu3 %v5197_v56  ;;  %2917 = vmatmul.bf16.vlgmr.msra.gmra.mxu2 %v5197_v56 }
 0x541   : > { %2922 = vmatpush.bf16.msrb.mxu3 %v3663_v54  ;;  %2948 = vmatpush.bf16.msrb.mxu2 %v3667_v20  ;;  %v4122_v54 = vld [vmem:[%s5725_s17 + $0x39c] sm:$0xf] }
 0x542   : > { %v3888_v20 = vld [vmem:[%s5725_s17 + $0x3b8] sm:$0xf0] }
 0x543   : > { %2938 = vmatpush.bf16.msra.mxu1 %v3823_v26  ;;  %v3891_v50 = vor.u32 %v4122_v54, %v3888_v20  ;;  %v3827_v26 = vor.u32 %v4106_v24, %v3824_v25 }
 0x545   : > { %2923 = vmatpush.bf16.msrb.mxu3 %v3631_v52  ;;  %2949 = vmatpush.bf16.msrb.mxu2 %v3635_v29  ;;  %v4098_v52 = vld [vmem:[%s5725_s17 + $0x2dc] sm:$0xf] }
 0x547   : > { %2939 = vmatpush.bf16.msra.mxu1 %v3791_v33  ;;  %v4074_v33 = vld [vmem:[%s5725_s17 + $0x21c] sm:$0xf] }
 0x549   : > { %2924 = vmatpush.bf16.msrb.mxu3 %v3599_v53  ;;  %2950 = vmatpush.bf16.msrb.mxu2 %v3603_v34  ;;  %v3696_v53 = vld [vmem:[%s5725_s17 + $0x238] sm:$0xf0] }
 0x54a   : > { %v3699_v34 = vor.u32 %v4074_v33, %v3696_v53 }
 0x54b   : > { %2940 = vmatpush.bf16.msra.mxu1 %v3759_v55 }
 0x54d   : > { %2925 = vmatpush.bf16.msrb.mxu3 %v3567_v57  ;;  %2951 = vmatpush.bf16.msrb.mxu2 %v3571_v42 }
 0x54f   : > { %2941 = vmatpush.bf16.msra.mxu1 %v3727_v62 }
 0x551   : > { %2926 = vmatpush.bf16.msrb.mxu3 %v3535_v43  ;;  %2952 = vmatpush.bf16.msrb.mxu2 %v3539_v63 }
 0x553   : > { %2942 = vmatpush.bf16.msra.mxu1 %v3695_v4 }
 0x555   : > { %2927 = vmatpush.bf16.msrb.mxu3 %v3503_v38  ;;  %2953 = vmatpush.bf16.msrb.mxu2 %v3507_v7 }
 0x556   : > { %2943 = vmatmul.bf16.vlgmr.msra.gmra.mxu1 %v5197_v56 }
 0x559   : > { %2928 = vmatpush.bf16.msrb.mxu3 %v3471_v39  ;;  %2954 = vmatpush.bf16.msrb.mxu2 %v3475_v10 }
 0x55d   : > { %2929 = vmatpush.bf16.msrb.mxu3 %v3439_v16  ;;  %2955 = vmatpush.bf16.msrb.mxu2 %v3443_v18 }
 0x560   : > { %2930 = vmatmul.bf16.vlgmr.msrb.gmra.mxu3 %v5233_v5  ;;  %2956 = vmatmul.bf16.vlgmr.msrb.gmra.mxu2 %v5233_v5  ;;  %v3792_v5 = vld [vmem:[%s5725_s17 + $0x2f8] sm:$0xf0] }
 0x561   : > { %2961 = vmatpush.bf16.msra.mxu3 %v3923_v19  ;;  %v3795_v29 = vor.u32 %v4098_v52, %v3792_v5 }
 0x565   : > { %2962 = vmatpush.bf16.msra.mxu3 %v3891_v50 }
 0x569   : > { %2963 = vmatpush.bf16.msra.mxu3 %v3859_v3 }
 0x56d   : > { %2964 = vmatpush.bf16.msra.mxu3 %v3827_v26 }
 0x571   : > { %2965 = vmatpush.bf16.msra.mxu3 %v3795_v29 }
 0x573   : > { %v2788_v37 = vpop.f32.mrf.mxu1 }
 0x575   : > { %2966 = vmatpush.bf16.msra.mxu3 %v3763_v28 }
 0x579   : > { %2967 = vmatpush.bf16.msra.mxu3 %v3731_v32 }
 0x57b   : > { %v2790_v40 = vpop.f32.mrf.mxu1 }
 0x57d   : > { %2968 = vmatpush.bf16.msra.mxu3 %v3699_v34 }
 0x580   : > { %2969 = vmatmul.bf16.vlgmr.msra.gmra.mxu3 %v5197_v56 }
 0x583   : > { %v2775_v41 = vpop.f32.mrf.mxu3  ;;  %v2801_v27 = vpop.f32.mrf.mxu2 }
 0x584   : > { %v2789_v51 = vadd.f32 %v2788_v37, %v2775_v41  ;;  %v2827_v46 = vpop.f32.mrf.mxu1 }
 0x586   : > { %2974 = vst [vmem:[%s5695_s23] sm:$0xff] %v2789_v51 }
 0x58b   : > { %v2777_v55 = vpop.f32.mrf.mxu3  ;;  %v2803_v57 = vpop.f32.mrf.mxu2 }
 0x58c   : > { %v2829_v42 = vpop.f32.mrf.mxu1 }
 0x593   : > { %v2814_v56 = vpop.f32.mrf.mxu3  ;;  %v2840_v59 = vpop.f32.mrf.mxu2 }
 0x594   : > { %v2815_v58 = vadd.f32 %v2814_v56, %v2801_v27  ;;  %v2841_v60 = vadd.f32 %v2840_v59, %v2827_v46  ;;  %v2866_v35 = vpop.f32.mrf.mxu1 }
 0x596   : > { %2975 = vst [vmem:[%s5695_s23 + $0x8] sm:$0xff] %v2815_v58 }
 0x597   : > { %2976 = vst [vmem:[%s5695_s23 + $0x10] sm:$0xff] %v2841_v60 }
 0x59b   : > { %v2816_v61 = vpop.f32.mrf.mxu3  ;;  %v2842_v0 = vpop.f32.mrf.mxu2 }
 0x59c   : > { %v2868_v62 = vpop.f32.mrf.mxu1 }
 0x5a3   : > { %v2853_v43 = vpop.f32.mrf.mxu3  ;;  %v2879_v36 = vpop.f32.mrf.mxu2 }
 0x5a4   : > { %v2867_v63 = vadd.f32 %v2866_v35, %v2853_v43 }
 0x5a6   : > { %2977 = vst [vmem:[%s5695_s23 + $0x18] sm:$0xff] %v2867_v63 }
 0x5ab   : > { %v2855_v6 = vpop.f32.mrf.mxu3  ;;  %v2881_v1 = vpop.f32.mrf.mxu2 }
 0x5b3   : > { %v2905_v2 = vpop.f32.mrf.mxu1 }
 0x5bb   : > { %v2907_v45 = vpop.f32.mrf.mxu1 }
 0x5c3   : > { %v2892_v11 = vpop.f32.mrf.mxu3  ;;  %v2918_v4 = vpop.f32.mrf.mxu2 }
 0x5c4   : > { %v2893_v38 = vadd.f32 %v2892_v11, %v2879_v36  ;;  %v2919_v7 = vadd.f32 %v2918_v4, %v2905_v2 }
 0x5c6   : > { %2978 = vst [vmem:[%s5695_s23 + $0x20] sm:$0xff] %v2893_v38 }
 0x5c7   : > { %2979 = vst [vmem:[%s5695_s23 + $0x28] sm:$0xff] %v2919_v7 }
 0x5cb   : > { %v2894_v17 = vpop.f32.mrf.mxu3  ;;  %v2920_v8 = vpop.f32.mrf.mxu2 }
 0x5d3   : > { %v2944_v47 = vpop.f32.mrf.mxu1 }
 0x5db   : > { %v2946_v9 = vpop.f32.mrf.mxu1 }
 0x5e3   : > { %v2931_v39 = vpop.f32.mrf.mxu3  ;;  %v2957_v10 = vpop.f32.mrf.mxu2 }
 0x5e4   : > { %v2945_v22 = vadd.f32 %v2944_v47, %v2931_v39 }
 0x5e6   : > { %2980 = vst [vmem:[%s5695_s23 + $0x30] sm:$0xff] %v2945_v22 }
 0x5eb   : > { %v2933_v12 = vpop.f32.mrf.mxu3  ;;  %v2959_v13 = vpop.f32.mrf.mxu2 }
 0x603   : > { %v2970_v14 = vpop.f32.mrf.mxu3 }
 0x604   : > { %v2971_v49 = vadd.f32 %v2970_v14, %v2957_v10 }
 0x606   : > { %2981 = vst [vmem:[%s5695_s23 + $0x38] sm:$0xff] %v2971_v49 }
 0x60b   : > { %v2972_v15 = vpop.f32.mrf.mxu3 }
 0x60c PF: > { %s28_s27 = sadd.s32 1, %s4270_s27  }
 0x60d   : > { %p25_p4 = scmp.ge.s32.totalorder %s28_s27, 4  }
 0x60f   :  { %27 = sbr.rel (!%p25_p4) target bundleno = 4 (0x4), region = 128 }

</bundles_post_ra>
